<compile_context>
chip_gen: v6e
topology: v6e:2x2x1
jax: 0.10.0
libtpu: 0.0.40
codegen_flags: <defaults>
</compile_context>

<pallas_src>
import functools

import jax
import jax.numpy as jnp
from jax import lax
from jax.experimental import pallas as pl
from jax.experimental.pallas import tpu as pltpu

LANES = 128  # lane width of the packed-parameter / output blocks


def _round_up(n, m):
    return ((n + m - 1) // m) * m


# ----------------------------- Pallas kernel ---------------------------------
def tspgnn_kernel(abd_ref, ax_ref, pp_ref, out_ref, *, E, H, Nn, Bt):
    BtE = Bt * E

    abd = abd_ref[0]        # (R, Bt*E): block-diag A_hat (rows [0,BtE)) + Bt "1/E" gap rows
    ax = ax_ref[0]          # (Bt*E, 1): A_hat @ edge_attr, all graphs of this step stacked

    # --- packed parameters (static, 8-aligned slices of the VMEM-resident block) ---
    w1 = pp_ref[0:1, :H]                   # (1, H)
    b1 = pp_ref[1:2, :H]                   # (1, H)
    b2 = pp_ref[2:3, :H]                   # (1, H)
    w3t = pp_ref[3:4, :H]                  # (1, H)   conv3 weight (16->1), transposed
    bmix = pp_ref[4:5, :]                  # (1, 128) mixing bias (lane-padded)
    wfc = pp_ref[5:6, :H]                  # (1, H)   fc weight (16->1)
    b3 = pp_ref[6:7, 0:1]                  # (1, 1)
    bfc = pp_ref[6:7, 1:2]                 # (1, 1)
    w2 = pp_ref[8:8 + H, :H]               # (H, H)
    wmixT = pp_ref[8 + H:8 + H + E, :]     # (E, 128) mixing Linear weight^T (lane-padded)

    # ---- conv1: GCN(1->16).  X@W1 is rank-1, so A@(x@w1) == (A@x)*w1; A@x precomputed. ----
    h = jnp.maximum(ax * w1 + b1, 0.0)                                   # (BtE, H)  VPU only

    # ---- conv2: GCN(16->16).  Shared-weight matmul stacked over all graphs, then one
    #      block-diagonal adjacency pass for the whole step. ----
    hw2 = jnp.dot(h, w2, preferred_element_type=jnp.float32)             # (BtE, H)
    h2 = jnp.dot(abd, hw2, preferred_element_type=jnp.float32)           # (R, H)  gap rows unused here
    h2 = jnp.maximum(h2[:BtE, :] + b2, 0.0)                              # (BtE, H) also feeds gap()

    # ---- conv3 + gap fused: [A_bd ; gap rows] @ h2 in a single MXU pass. ----
    tg = jnp.dot(abd, h2, preferred_element_type=jnp.float32)            # (R, H)
    c = jnp.sum(tg[:BtE, :] * w3t, axis=-1, keepdims=True) + b3          # (BtE, 1) == (A@h2)@w3 + b3
    v = tg[BtE:BtE + Bt, :]                                              # (Bt, H) per-graph mean of h2

    # ---- mixing Linear(num_edges -> num_nodes): stack the Bt per-graph c vectors into
    #      the lanes of an (E, Bt) matrix (pure VPU selects) and do ONE dot against wmixT. ----
    col = lax.broadcasted_iota(jnp.int32, (E, Bt), 1)
    c_cols = jnp.zeros((E, Bt), jnp.float32)
    for g in range(Bt):                                                  # unrolled, Bt is static
        c_g = c[g * E:(g + 1) * E, :]                                    # (E, 1) aligned slice
        c_cols = c_cols + jnp.where(col == g, c_g, 0.0)                  # place graph g into lane g
    mix = lax.dot_general(c_cols, wmixT, (((0,), (0,)), ((), ())),
                          preferred_element_type=jnp.float32) + bmix     # (Bt, 128)
    mix = jnp.maximum(mix, 0.0)

    # ---- masked softmax over the valid node lanes (EXACT normalization) ----
    lane = lax.broadcasted_iota(jnp.int32, (Bt, LANES), 1)
    valid = lane < Nn
    mix = jnp.where(valid, mix, -1e30)
    m = jnp.max(mix, axis=-1, keepdims=True)
    e = jnp.where(valid, jnp.exp(mix - m), 0.0)
    choice = e / jnp.sum(e, axis=-1, keepdims=True)                      # (Bt, 128)

    # ---- fc: Linear(16 -> 1) on the pooled features ----
    value = jnp.sum(v * wfc, axis=-1, keepdims=True) + bfc               # (Bt, 1)

    # ---- lane-dense output slab: choice in lanes [0,Nn), value at lane Nn ----
    out_ref[0] = choice + jnp.where(lane == Nn, value, 0.0)


# ------------------------------ wrapper ---------------------------------------
@functools.partial(jax.jit, static_argnames=("num_nodes", "hidden", "num_steps"))
def tspgnn_forward(a_hat, x, packed_params, *, num_nodes, hidden=16, num_steps=2):
    """a_hat: (B,E,E), x: (B,E,1), packed_params: (8+H+E, 128).
    Returns (choice (B, num_nodes), value (B,))."""
    B, E, _ = a_hat.shape
    assert B % num_steps == 0, "batch must divide evenly into grid steps"
    assert num_nodes < LANES, "num_nodes (+1 value lane) must fit in a 128-lane row"
    Bt = B // num_steps
    BtE = Bt * E
    R = _round_up(BtE + Bt, 8)
    P = packed_params.shape[0]

    # conv1 message passing (A_hat @ x) is a rank-1 matvec; hoist it to XLA so the
    # kernel never runs a 1-lane-RHS MXU pass and x needs no separate micro-DMA shape.
    ax = jnp.einsum("bij,bjk->bik", a_hat, x).reshape(num_steps, BtE, 1)

    # Block-diagonal adjacency per step: rows [0,BtE) = diag(A_hat_g); row BtE+g holds
    # 1/E over graph g's columns so one MXU pass yields conv3's A@h2 AND the mean pools.
    a_grp = a_hat.reshape(num_steps, Bt, E, E)
    abd = jnp.zeros((num_steps, R, BtE), jnp.float32)
    for g in range(Bt):
        abd = abd.at[:, g * E:(g + 1) * E, g * E:(g + 1) * E].set(a_grp[:, g])
        abd = abd.at[:, BtE + g, g * E:(g + 1) * E].set(1.0 / E)

    kernel = functools.partial(tspgnn_kernel, E=E, H=hidden, Nn=num_nodes, Bt=Bt)

    out = pl.pallas_call(
        kernel,
        out_shape=jax.ShapeDtypeStruct((num_steps, Bt, LANES), jnp.float32),
        grid_spec=pltpu.PrefetchScalarGridSpec(
            num_scalar_prefetch=0,
            grid=(num_steps,),
            in_specs=[
                pl.BlockSpec((1, R, BtE), lambda s: (s, 0, 0)),     # block-diag adjacency + gap rows
                pl.BlockSpec((1, BtE, 1), lambda s: (s, 0, 0)),     # precomputed A@x column
                pl.BlockSpec((P, LANES), lambda s: (0, 0)),         # packed params: VMEM resident
            ],
            out_specs=pl.BlockSpec((1, Bt, LANES), lambda s: (s, 0, 0)),
        ),
        compiler_params=pltpu.CompilerParams(
            dimension_semantics=("parallel",)),  # 2 steps -> shards across v7x's 2 TensorCores
    )(abd, ax, packed_params)

    out = out.reshape(B, LANES)
    choice = out[:, :num_nodes]
    value = out[:, num_nodes]
    return choice, value


# ------------------------------ glue / setup -----------------------------------
def build_gcn_adjacency(edge_index, num_entities):
    """Dense A_hat = D^{-1/2} (A + I) D^{-1/2}, matching PyG GCNConv default norm."""
    src, dst = edge_index[0], edge_index[1]
    A = jnp.zeros((num_entities, num_entities), jnp.float32)
    A = A.at[dst, src].add(1.0)                 # message j->i lands in row i
    A = A + jnp.eye(num_entities, dtype=jnp.float32)
    deg = jnp.sum(A, axis=1)
    dinv = jnp.where(deg > 0, 1.0 / jnp.sqrt(deg), 0.0)
    return dinv[:, None] * A * dinv[None, :]


def init_params(key, num_edges, num_nodes, hidden=16):
    ks = jax.random.split(key, 8)
    s = 0.1
    # TODO(synk): PyTorch constructs a *fresh* nn.Linear(num_edges, num_nodes) inside forward()
    # (new random weights every call); here wmixT/bmix are fixed parameters.
    return {
        "w1":    s * jax.random.normal(ks[0], (1, hidden), jnp.float32),
        "b1":    jnp.zeros((1, hidden), jnp.float32),
        "w2":    s * jax.random.normal(ks[1], (hidden, hidden), jnp.float32),
        "b2":    jnp.zeros((1, hidden), jnp.float32),
        "w3t":   s * jax.random.normal(ks[2], (1, hidden), jnp.float32),   # conv3 weight, transposed
        "b3":    jnp.zeros((1, 1), jnp.float32),
        "wmixT": s * jax.random.normal(ks[3], (num_edges, num_nodes), jnp.float32),
        "bmix":  s * jax.random.normal(ks[4], (1, num_nodes), jnp.float32),
        "wfc":   s * jax.random.normal(ks[5], (1, hidden), jnp.float32),   # Linear(16->1) weight
        "bfc":   s * jax.random.normal(ks[6], (1, 1), jnp.float32),
    }


def pack_params(params, num_edges, num_nodes, hidden=16):
    """Pack all parameters into one lane-padded (8 + H + E, 128) f32 block.

    rows 0..5          : w1, b1, b2, w3t, bmix(padded), wfc
    row  6             : lane 0 = b3, lane 1 = bfc
    row  7             : unused (zeros)
    rows [8, 8+H)      : w2
    rows [8+H, 8+H+E)  : wmixT (lanes 0..Nn-1)
    Small params first so every slice start is 8-aligned for any E.
    """
    E, H, Nn = num_edges, hidden, num_nodes
    rows = _round_up(8 + H + E, 8)
    pp = jnp.zeros((rows, LANES), jnp.float32)
    pp = pp.at[0, 0:H].set(params["w1"][0])
    pp = pp.at[1, 0:H].set(params["b1"][0])
    pp = pp.at[2, 0:H].set(params["b2"][0])
    pp = pp.at[3, 0:H].set(params["w3t"][0])
    pp = pp.at[4, 0:Nn].set(params["bmix"][0])
    pp = pp.at[5, 0:H].set(params["wfc"][0])
    pp = pp.at[6, 0].set(params["b3"][0, 0])
    pp = pp.at[6, 1].set(params["bfc"][0, 0])
    pp = pp.at[8:8 + H, 0:H].set(params["w2"])
    pp = pp.at[8 + H:8 + H + E, 0:Nn].set(params["wmixT"])
    return pp


def reference_forward_single(a_hat, x, params):
    """Plain-JAX reference of the same math for one graph (sanity check)."""
    h = jnp.maximum(a_hat @ (x @ params["w1"]) + params["b1"], 0.0)
    h2 = jnp.maximum(a_hat @ (h @ params["w2"]) + params["b2"], 0.0)
    c = a_hat @ (h2 @ params["w3t"].T) + params["b3"]                    # (E,1)
    mix = c.reshape(1, -1) @ params["wmixT"] + params["bmix"]            # (1,Nn)
    mix = jnp.maximum(mix, 0.0)
    choice = jax.nn.softmax(mix[0], axis=0)
    v = jnp.mean(h2, axis=0, keepdims=True)                              # gap (mean pool)
    value = (v @ params["wfc"].T + params["bfc"])[0, 0]
    return choice, value


# --------------------------------- main ----------------------------------------
if __name__ == "__main__":
    key = jax.random.PRNGKey(0)
    k_edges, k_x, k_params = jax.random.split(key, 3)

    B = 8              # batch of graphs
    num_edges = 64     # E: rows of edge_attr ("entities" the GCN operates on)
    num_nodes = 16     # graph.num_nodes (output dim of mixing Linear / choice)
    num_links = 128    # columns of edge_index
    hidden = 16
    num_steps = 2      # 2 "parallel" grid steps (one per v7x TensorCore); near-free on v5e/v6e

    edge_index = jax.random.randint(k_edges, (B, 2, num_links), 0, num_edges, jnp.int32)
    edge_attr = jax.random.normal(k_x, (B, num_edges, 1), jnp.float32)

    a_hat = jnp.stack([build_gcn_adjacency(edge_index[b], num_edges) for b in range(B)])
    params = init_params(k_params, num_edges, num_nodes, hidden)
    packed = pack_params(params, num_edges, num_nodes, hidden)

    choice, value = tspgnn_forward(a_hat, edge_attr, packed,
                                   num_nodes=num_nodes, hidden=hidden,
                                   num_steps=num_steps)
    jax.block_until_ready((choice, value))

    # sanity check against a plain-JAX reference
    choice_ref, value_ref = jax.vmap(
        lambda a, xx: reference_forward_single(a, xx, params))(a_hat, edge_attr)

    assert choice.shape == (B, num_nodes)
    assert value.shape == (B,)
    assert jnp.allclose(jnp.sum(choice, axis=-1), 1.0, atol=1e-3)
    assert jnp.allclose(choice, choice_ref, atol=2e-3, rtol=2e-3)
    assert jnp.allclose(value, value_ref, atol=2e-3, rtol=2e-3)

    print("KERNEL_OK")
</pallas_src>

<mosaic_0001>
module attributes {stable_mosaic.version = 11 : i64} {
  func.func @tspgnn_kernel(%arg0: i32, %arg1: memref<1x264x256xf32, #tpu.memory_space<vmem>>, %arg2: memref<1x256x1xf32, #tpu.memory_space<vmem>>, %arg3: memref<88x128xf32, #tpu.memory_space<vmem>>, %arg4: memref<1x4x128xf32, #tpu.memory_space<vmem>>) attributes {dimension_semantics = [#tpu.dimension_semantics<parallel>], iteration_bounds = array<i64: 2>, scalar_prefetch = 0 : i64, scratch_operands = 0 : i64, tpu.core_type = #tpu.core_type<tc>, window_params = [{transform_indices = @transform_0, window_bounds = array<i64: 1, 264, 256>}, {transform_indices = @transform_1, window_bounds = array<i64: 1, 256, 1>}, {pipeline_mode = #tpu.pipeline_mode<synchronous>, transform_indices = @transform_2, window_bounds = array<i64: 88, 128>}, {transform_indices = @transform_3, window_bounds = array<i64: 1, 4, 128>}]} {
    %c0 = arith.constant 0 : index
    %c0_0 = arith.constant 0 : index
    %c0_1 = arith.constant 0 : index
    %0 = vector.load %arg1[%c0, %c0_0, %c0_1] : memref<1x264x256xf32, #tpu.memory_space<vmem>>, vector<1x264x256xf32>
    %1 = vector.shape_cast %0 : vector<1x264x256xf32> to vector<264x256xf32>
    %c0_2 = arith.constant 0 : index
    %c0_3 = arith.constant 0 : index
    %c0_4 = arith.constant 0 : index
    %2 = vector.load %arg2[%c0_2, %c0_3, %c0_4] : memref<1x256x1xf32, #tpu.memory_space<vmem>>, vector<1x256x1xf32>
    %3 = vector.shape_cast %2 : vector<1x256x1xf32> to vector<256x1xf32>
    %c0_5 = arith.constant 0 : index
    %c0_6 = arith.constant 0 : index
    %4 = vector.load %arg3[%c0_5, %c0_6] : memref<88x128xf32, #tpu.memory_space<vmem>>, vector<1x16xf32>
    %c1 = arith.constant 1 : index
    %c0_7 = arith.constant 0 : index
    %5 = vector.load %arg3[%c1, %c0_7] : memref<88x128xf32, #tpu.memory_space<vmem>>, vector<1x16xf32>
    %c2 = arith.constant 2 : index
    %c0_8 = arith.constant 0 : index
    %6 = vector.load %arg3[%c2, %c0_8] : memref<88x128xf32, #tpu.memory_space<vmem>>, vector<1x16xf32>
    %c3 = arith.constant 3 : index
    %c0_9 = arith.constant 0 : index
    %7 = vector.load %arg3[%c3, %c0_9] : memref<88x128xf32, #tpu.memory_space<vmem>>, vector<1x16xf32>
    %c4 = arith.constant 4 : index
    %c0_10 = arith.constant 0 : index
    %8 = vector.load %arg3[%c4, %c0_10] : memref<88x128xf32, #tpu.memory_space<vmem>>, vector<1x128xf32>
    %c5 = arith.constant 5 : index
    %c0_11 = arith.constant 0 : index
    %9 = vector.load %arg3[%c5, %c0_11] : memref<88x128xf32, #tpu.memory_space<vmem>>, vector<1x16xf32>
    %c6 = arith.constant 6 : index
    %c0_12 = arith.constant 0 : index
    %10 = vector.load %arg3[%c6, %c0_12] : memref<88x128xf32, #tpu.memory_space<vmem>>, vector<1x1xf32>
    %c6_13 = arith.constant 6 : index
    %c1_14 = arith.constant 1 : index
    %11 = vector.load %arg3[%c6_13, %c1_14] : memref<88x128xf32, #tpu.memory_space<vmem>>, vector<1x1xf32>
    %c8 = arith.constant 8 : index
    %c0_15 = arith.constant 0 : index
    %12 = vector.load %arg3[%c8, %c0_15] : memref<88x128xf32, #tpu.memory_space<vmem>>, vector<16x16xf32>
    %c24 = arith.constant 24 : index
    %c0_16 = arith.constant 0 : index
    %13 = vector.load %arg3[%c24, %c0_16] : memref<88x128xf32, #tpu.memory_space<vmem>>, vector<64x128xf32>
    %14 = vector.broadcast %3 : vector<256x1xf32> to vector<256x16xf32>
    %15 = vector.broadcast %4 : vector<1x16xf32> to vector<256x16xf32>
    %16 = arith.mulf %14, %15 : vector<256x16xf32>
    %17 = vector.broadcast %5 : vector<1x16xf32> to vector<256x16xf32>
    %18 = arith.addf %16, %17 : vector<256x16xf32>
    %cst = arith.constant 0.000000e+00 : f32
    %19 = vector.broadcast %cst : f32 to vector<256x16xf32>
    %20 = arith.maximumf %18, %19 : vector<256x16xf32>
    %cst_17 = arith.constant dense<0.000000e+00> : vector<256x16xf32>
    %21 = tpu.matmul %20, %12, %cst_17 {dimension_numbers = #tpu.dot_dimension_numbers<[1], [0], [0], [1], [0, 0, 1, 1], [], []>} : vector<256x16xf32>, vector<16x16xf32>, vector<256x16xf32> -> vector<256x16xf32>
    %cst_18 = arith.constant dense<0.000000e+00> : vector<264x16xf32>
    %22 = tpu.matmul %1, %21, %cst_18 {dimension_numbers = #tpu.dot_dimension_numbers<[1], [0], [0], [1], [0, 0, 1, 1], [], []>} : vector<264x256xf32>, vector<256x16xf32>, vector<264x16xf32> -> vector<264x16xf32>
    %23 = vector.extract_strided_slice %22 {offsets = [0, 0], sizes = [256, 16], strides = [1, 1]} : vector<264x16xf32> to vector<256x16xf32>
    %24 = vector.broadcast %6 : vector<1x16xf32> to vector<256x16xf32>
    %25 = arith.addf %23, %24 : vector<256x16xf32>
    %cst_19 = arith.constant 0.000000e+00 : f32
    %26 = vector.broadcast %cst_19 : f32 to vector<256x16xf32>
    %27 = arith.maximumf %25, %26 : vector<256x16xf32>
    %cst_20 = arith.constant dense<0.000000e+00> : vector<264x16xf32>
    %28 = tpu.matmul %1, %27, %cst_20 {dimension_numbers = #tpu.dot_dimension_numbers<[1], [0], [0], [1], [0, 0, 1, 1], [], []>} : vector<264x256xf32>, vector<256x16xf32>, vector<264x16xf32> -> vector<264x16xf32>
    %29 = vector.extract_strided_slice %28 {offsets = [0, 0], sizes = [256, 16], strides = [1, 1]} : vector<264x16xf32> to vector<256x16xf32>
    %30 = vector.broadcast %7 : vector<1x16xf32> to vector<256x16xf32>
    %31 = arith.mulf %29, %30 : vector<256x16xf32>
    %cst_21 = arith.constant dense<0.000000e+00> : vector<256xf32>
    %32 = vector.multi_reduction <add>, %31, %cst_21 [1] : vector<256x16xf32> to vector<256xf32>
    %33 = vector.shape_cast %32 : vector<256xf32> to vector<256x1xf32>
    %34 = vector.broadcast %10 : vector<1x1xf32> to vector<256x1xf32>
    %35 = arith.addf %33, %34 : vector<256x1xf32>
    %36 = vector.extract_strided_slice %28 {offsets = [256, 0], sizes = [4, 16], strides = [1, 1]} : vector<264x16xf32> to vector<4x16xf32>
    %37 = tpu.iota {dimensions = array<i32: 1>} : vector<64x4xi32>
    %cst_22 = arith.constant 0.000000e+00 : f32
    %38 = vector.broadcast %cst_22 : f32 to vector<64x4xf32>
    %39 = vector.extract_strided_slice %35 {offsets = [0, 0], sizes = [64, 1], strides = [1, 1]} : vector<256x1xf32> to vector<64x1xf32>
    %c0_i32 = arith.constant 0 : i32
    %40 = vector.broadcast %c0_i32 : i32 to vector<64x4xi32>
    %41 = arith.cmpi eq, %37, %40 : vector<64x4xi32>
    %cst_23 = arith.constant 0.000000e+00 : f32
    %42 = vector.shape_cast %39 : vector<64x1xf32> to vector<64x1xf32>
    %43 = vector.broadcast %42 : vector<64x1xf32> to vector<64x4xf32>
    %44 = vector.broadcast %cst_23 : f32 to vector<64x4xf32>
    %45 = arith.select %41, %43, %44 : vector<64x4xi1>, vector<64x4xf32>
    %46 = arith.addf %38, %45 : vector<64x4xf32>
    %47 = vector.extract_strided_slice %35 {offsets = [64, 0], sizes = [64, 1], strides = [1, 1]} : vector<256x1xf32> to vector<64x1xf32>
    %c1_i32 = arith.constant 1 : i32
    %48 = vector.broadcast %c1_i32 : i32 to vector<64x4xi32>
    %49 = arith.cmpi eq, %37, %48 : vector<64x4xi32>
    %cst_24 = arith.constant 0.000000e+00 : f32
    %50 = vector.shape_cast %47 : vector<64x1xf32> to vector<64x1xf32>
    %51 = vector.broadcast %50 : vector<64x1xf32> to vector<64x4xf32>
    %52 = vector.broadcast %cst_24 : f32 to vector<64x4xf32>
    %53 = arith.select %49, %51, %52 : vector<64x4xi1>, vector<64x4xf32>
    %54 = arith.addf %46, %53 : vector<64x4xf32>
    %55 = vector.extract_strided_slice %35 {offsets = [128, 0], sizes = [64, 1], strides = [1, 1]} : vector<256x1xf32> to vector<64x1xf32>
    %c2_i32 = arith.constant 2 : i32
    %56 = vector.broadcast %c2_i32 : i32 to vector<64x4xi32>
    %57 = arith.cmpi eq, %37, %56 : vector<64x4xi32>
    %cst_25 = arith.constant 0.000000e+00 : f32
    %58 = vector.shape_cast %55 : vector<64x1xf32> to vector<64x1xf32>
    %59 = vector.broadcast %58 : vector<64x1xf32> to vector<64x4xf32>
    %60 = vector.broadcast %cst_25 : f32 to vector<64x4xf32>
    %61 = arith.select %57, %59, %60 : vector<64x4xi1>, vector<64x4xf32>
    %62 = arith.addf %54, %61 : vector<64x4xf32>
    %63 = vector.extract_strided_slice %35 {offsets = [192, 0], sizes = [64, 1], strides = [1, 1]} : vector<256x1xf32> to vector<64x1xf32>
    %c3_i32 = arith.constant 3 : i32
    %64 = vector.broadcast %c3_i32 : i32 to vector<64x4xi32>
    %65 = arith.cmpi eq, %37, %64 : vector<64x4xi32>
    %cst_26 = arith.constant 0.000000e+00 : f32
    %66 = vector.shape_cast %63 : vector<64x1xf32> to vector<64x1xf32>
    %67 = vector.broadcast %66 : vector<64x1xf32> to vector<64x4xf32>
    %68 = vector.broadcast %cst_26 : f32 to vector<64x4xf32>
    %69 = arith.select %65, %67, %68 : vector<64x4xi1>, vector<64x4xf32>
    %70 = arith.addf %62, %69 : vector<64x4xf32>
    %cst_27 = arith.constant dense<0.000000e+00> : vector<4x128xf32>
    %71 = tpu.matmul %70, %13, %cst_27 {dimension_numbers = #tpu.dot_dimension_numbers<[0], [0], [1], [1], [0, 1, 1, 1], [], []>} : vector<64x4xf32>, vector<64x128xf32>, vector<4x128xf32> -> vector<4x128xf32>
    %72 = vector.broadcast %8 : vector<1x128xf32> to vector<4x128xf32>
    %73 = arith.addf %71, %72 : vector<4x128xf32>
    %cst_28 = arith.constant 0.000000e+00 : f32
    %74 = vector.broadcast %cst_28 : f32 to vector<4x128xf32>
    %75 = arith.maximumf %73, %74 : vector<4x128xf32>
    %76 = tpu.iota {dimensions = array<i32: 1>} : vector<4x128xi32>
    %c16_i32 = arith.constant 16 : i32
    %77 = vector.broadcast %c16_i32 : i32 to vector<4x128xi32>
    %78 = arith.cmpi slt, %76, %77 : vector<4x128xi32>
    %cst_29 = arith.constant -1.000000e+30 : f32
    %79 = vector.broadcast %cst_29 : f32 to vector<4x128xf32>
    %80 = arith.select %78, %75, %79 : vector<4x128xi1>, vector<4x128xf32>
    %cst_30 = arith.constant dense<0xFF800000> : vector<4xf32>
    %81 = vector.multi_reduction <maximumf>, %80, %cst_30 [1] : vector<4x128xf32> to vector<4xf32>
    %82 = vector.shape_cast %81 : vector<4xf32> to vector<4x1xf32>
    %83 = vector.broadcast %82 : vector<4x1xf32> to vector<4x128xf32>
    %84 = arith.subf %80, %83 : vector<4x128xf32>
    %85 = math.exp %84 : vector<4x128xf32>
    %cst_31 = arith.constant 0.000000e+00 : f32
    %86 = vector.broadcast %cst_31 : f32 to vector<4x128xf32>
    %87 = arith.select %78, %85, %86 : vector<4x128xi1>, vector<4x128xf32>
    %cst_32 = arith.constant dense<0.000000e+00> : vector<4xf32>
    %88 = vector.multi_reduction <add>, %87, %cst_32 [1] : vector<4x128xf32> to vector<4xf32>
    %89 = vector.shape_cast %88 : vector<4xf32> to vector<4x1xf32>
    %90 = vector.broadcast %89 : vector<4x1xf32> to vector<4x128xf32>
    %91 = arith.divf %87, %90 : vector<4x128xf32>
    %92 = vector.broadcast %9 : vector<1x16xf32> to vector<4x16xf32>
    %93 = arith.mulf %36, %92 : vector<4x16xf32>
    %cst_33 = arith.constant dense<0.000000e+00> : vector<4xf32>
    %94 = vector.multi_reduction <add>, %93, %cst_33 [1] : vector<4x16xf32> to vector<4xf32>
    %95 = vector.shape_cast %94 : vector<4xf32> to vector<4x1xf32>
    %96 = vector.broadcast %11 : vector<1x1xf32> to vector<4x1xf32>
    %97 = arith.addf %95, %96 : vector<4x1xf32>
    %c16_i32_34 = arith.constant 16 : i32
    %98 = vector.broadcast %c16_i32_34 : i32 to vector<4x128xi32>
    %99 = arith.cmpi eq, %76, %98 : vector<4x128xi32>
    %cst_35 = arith.constant 0.000000e+00 : f32
    %100 = vector.shape_cast %97 : vector<4x1xf32> to vector<4x1xf32>
    %101 = vector.broadcast %100 : vector<4x1xf32> to vector<4x128xf32>
    %102 = vector.broadcast %cst_35 : f32 to vector<4x128xf32>
    %103 = arith.select %99, %101, %102 : vector<4x128xi1>, vector<4x128xf32>
    %104 = arith.addf %91, %103 : vector<4x128xf32>
    %c0_36 = arith.constant 0 : index
    %c0_37 = arith.constant 0 : index
    %c0_38 = arith.constant 0 : index
    %105 = vector.load %arg4[%c0_36, %c0_37, %c0_38] : memref<1x4x128xf32, #tpu.memory_space<vmem>>, vector<1x4x128xf32>
    %106 = vector.shape_cast %105 : vector<1x4x128xf32> to vector<4x128xf32>
    %107 = vector.shape_cast %104 : vector<4x128xf32> to vector<1x4x128xf32>
    tpu.vector_store %arg4[%c0_36, %c0_37, %c0_38], %107 {strides = array<i32>} : memref<1x4x128xf32, #tpu.memory_space<vmem>>, vector<1x4x128xf32>,
    return
  }
  func.func @transform_0(%arg0: i32) -> (i32, i32, i32) {
    %c0_i32 = arith.constant 0 : i32
    %c0_i32_0 = arith.constant 0 : i32
    %c0_i32_1 = arith.constant 0 : i32
    return %arg0, %c0_i32, %c0_i32_0 : i32, i32, i32
  }
  func.func @transform_1(%arg0: i32) -> (i32, i32, i32) {
    %c0_i32 = arith.constant 0 : i32
    %c0_i32_0 = arith.constant 0 : i32
    %c0_i32_1 = arith.constant 0 : i32
    return %arg0, %c0_i32, %c0_i32_0 : i32, i32, i32
  }
  func.func @transform_2(%arg0: i32) -> (i32, i32) {
    %c0_i32 = arith.constant 0 : i32
    %c0_i32_0 = arith.constant 0 : i32
    %c0_i32_1 = arith.constant 0 : i32
    return %c0_i32, %c0_i32_0 : i32, i32
  }
  func.func @transform_3(%arg0: i32) -> (i32, i32, i32) {
    %c0_i32 = arith.constant 0 : i32
    %c0_i32_0 = arith.constant 0 : i32
    %c0_i32_1 = arith.constant 0 : i32
    return %arg0, %c0_i32, %c0_i32_0 : i32, i32, i32
  }
}

</mosaic_0001>

<bundles_post_ra>
// kernel: tspgnn_forward.1
= control target key start
LH: loop header
LB: loop body
LE: loop exit
PB: predicated region body
PF: predicated region fallthrough
CT: control target
= control target key end

     0   :  { %s2244_s12 = smov 0   ;;  %s3117_s0 = inlined_call_operand.vmem [shape: f32[2,264,256], index: 0, kind: input, shape index: {}]   ;;  %s3118_s1 = inlined_call_operand.vmem [shape: f32[2,256,1], index: 1, kind: input, shape index: {}]   ;;  %s3119_s2 = inlined_call_operand.vmem [shape: f32[88,128], index: 2, kind: input, shape index: {}]   ;;  %s3120_s3 = inlined_call_operand.vmem [shape: f32[2,4,128], index: 3, kind: output, shape index: {}]  }
   0x1 LB: > { %s2025_s13 = sadd.s32 4294967295, %s2218_s12   ;;  %p2029_p0 = scmp.ge.s32.totalorder %s2218_s12, 1  ;;  %s2218_s12 = sphi %s2244_s12, %s13_s12  }
   0x2   : > { %p147_p1 = scmp.lt.s32.totalorder %s2218_s12, 3 }
   0x4   : > { %p148_p2 = pnand %p2029_p0, %p147_p1 }
   0x6   : > { %151 = sbr.rel (%p148_p2) target bundleno = 1985 (0x7c1), region = 32 }
   0xb   : > { %p175_p3 = scmp.lt.s32.totalorder %s2025_s13, 1  ;;  %v2220_v0 = vmov 0   ;;  %v295_v9 = vld [vmem:[%s3119_s2 + $0x10] sm:$0xff]  ;;  %v294_v10 = vld [vmem:[%s3119_s2 + $0x8] sm:$0xff]  ;;  %v2301_v35 = vld [vmem:[%s3119_s2] ss:$0 sm:$0xff] }
   0xc   : > { %2205 = vset.pattern.permute.xlu1 %v2220_v0  ;;  %2204 = vset.pattern.permute.xlu0 %v2220_v0  ;;  %v2306_v36 = vld [vmem:[%s3119_s2 + $0x1] ss:$0 sm:$0xff]  ;;  %vm568_vm0 = vcmask 130048   ;;  %vm2222_vm1 = vmmov 0   ;;  %vm1851_vm6 = vcmask 523264   ;;  %vm1928_vm8 = vcmask 1043456  }
   0xd   : > { %s3209_s13 = smov (!%p175_p3, %s2025_s13), 1  ;;  %2120 = vmatprep.subr.mxu0 %v295_v9  ;;  %vm1946_vm9 = vcmask 125952  }
   0xe   : > { %s2076_s14 = sshll.u32 %s3209_s13, 8  ;;  %2121 = vmatpush3.msra.mxu0 %v295_v9  ;;  %s2191_s26 = smul.u32 528, %s3209_s13 }
   0xf   : > { %s2258_s17 = scalar_lea.vmem %s3118_s1, %s2076_s14  ;;  %2122 = vmatprep.subr.mxu0 %v294_v10  ;;  %s2033_s4 = sshll.u32 %s3209_s13, 2 }
  0x10   : > { %v257_v1 = vld [vmem:[%s2258_s17 + $0x10] sm:$0xff]  ;;  %v255_v2 = vld [vmem:[%s2258_s17] sm:$0xff]  ;;  %v258_v3 = vld [vmem:[%s2258_s17 + $0x18] sm:$0xff]  ;;  %2123 = vmatpush3.msra.mxu0 %v294_v10  ;;  %s2410_s29 = scalar_lea.vmem %s3117_s0, %s2191_s26  ;;  %s188_s7 = scalar_lea.vmem %s3120_s3, %s2033_s4 }
  0x11   : > { %316 = vperm.xlu1 %2205, %v257_v1   ;;  %306 = vperm.xlu0 %2204, %v255_v2   ;;  %v256_v4 = vld [vmem:[%s2258_s17 + $0x8] sm:$0xff]  ;;  %v259_v6 = vld [vmem:[%s2258_s17 + $0x20] sm:$0xff]  ;;  %v262_v7 = vld [vmem:[%s2258_s17 + $0x38] sm:$0xff] }
  0x12   : > { %v260_v5 = vld [vmem:[%s2258_s17 + $0x28] sm:$0xff]  ;;  %v261_v8 = vld [vmem:[%s2258_s17 + $0x30] sm:$0xff]  ;;  %v263_v12 = vld [vmem:[%s2258_s17 + $0x40] sm:$0xff] }
  0x13   : > { %v264_v11 = vld [vmem:[%s2258_s17 + $0x48] sm:$0xff]  ;;  %v266_v13 = vld [vmem:[%s2258_s17 + $0x58] sm:$0xff]  ;;  %v265_v14 = vld [vmem:[%s2258_s17 + $0x50] sm:$0xff] }
  0x14   : > { %v268_v15 = vld [vmem:[%s2258_s17 + $0x68] sm:$0xff]  ;;  %v267_v16 = vld [vmem:[%s2258_s17 + $0x60] sm:$0xff]  ;;  %v270_v17 = vld [vmem:[%s2258_s17 + $0x78] sm:$0xff] }
  0x15   : > { %321 = vperm.xlu1 %2205, %v258_v3   ;;  %311 = vperm.xlu0 %2204, %v256_v4   ;;  %v269_v18 = vld [vmem:[%s2258_s17 + $0x70] sm:$0xff]  ;;  %v272_v19 = vld [vmem:[%s2258_s17 + $0x88] sm:$0xff]  ;;  %v271_v20 = vld [vmem:[%s2258_s17 + $0x80] sm:$0xff] }
  0x16   : > { %v274_v21 = vld [vmem:[%s2258_s17 + $0x98] sm:$0xff]  ;;  %v273_v22 = vld [vmem:[%s2258_s17 + $0x90] sm:$0xff]  ;;  %v276_v23 = vld [vmem:[%s2258_s17 + $0xa8] sm:$0xff] }
  0x17   : > { %v275_v24 = vld [vmem:[%s2258_s17 + $0xa0] sm:$0xff]  ;;  %v278_v25 = vld [vmem:[%s2258_s17 + $0xb8] sm:$0xff]  ;;  %v277_v26 = vld [vmem:[%s2258_s17 + $0xb0] sm:$0xff] }
  0x18   : > { %v280_v27 = vld [vmem:[%s2258_s17 + $0xc8] sm:$0xff]  ;;  %v279_v28 = vld [vmem:[%s2258_s17 + $0xc0] sm:$0xff]  ;;  %v282_v29 = vld [vmem:[%s2258_s17 + $0xd8] sm:$0xff] }
  0x19   : > { %331 = vperm.xlu1 %2205, %v260_v5   ;;  %326 = vperm.xlu0 %2204, %v259_v6   ;;  %v281_v30 = vld [vmem:[%s2258_s17 + $0xd0] sm:$0xff]  ;;  %v284_v31 = vld [vmem:[%s2258_s17 + $0xe8] sm:$0xff]  ;;  %v283_v32 = vld [vmem:[%s2258_s17 + $0xe0] sm:$0xff] }
  0x1a   : > { %v286_v33 = vld [vmem:[%s2258_s17 + $0xf8] sm:$0xff]  ;;  %v285_v34 = vld [vmem:[%s2258_s17 + $0xf0] sm:$0xff] }
  0x1d   : > { %341 = vperm.xlu1 %2205, %v262_v7   ;;  %336 = vperm.xlu0 %2204, %v261_v8  }
  0x21   : > { %351 = vperm.xlu1 %2205, %v264_v11   ;;  %346 = vperm.xlu0 %2204, %v263_v12  }
  0x25   : > { %361 = vperm.xlu1 %2205, %v266_v13   ;;  %356 = vperm.xlu0 %2204, %v265_v14  }
  0x29   : > { %371 = vperm.xlu1 %2205, %v268_v15   ;;  %366 = vperm.xlu0 %2204, %v267_v16  }
  0x2d   : > { %381 = vperm.xlu1 %2205, %v270_v17   ;;  %376 = vperm.xlu0 %2204, %v269_v18  }
  0x31   : > { %391 = vperm.xlu1 %2205, %v272_v19   ;;  %386 = vperm.xlu0 %2204, %v271_v20  }
  0x35   : > { %401 = vperm.xlu1 %2205, %v274_v21   ;;  %396 = vperm.xlu0 %2204, %v273_v22  }
  0x39   : > { %411 = vperm.xlu1 %2205, %v276_v23   ;;  %406 = vperm.xlu0 %2204, %v275_v24  }
  0x3d   : > { %421 = vperm.xlu1 %2205, %v278_v25   ;;  %416 = vperm.xlu0 %2204, %v277_v26  }
  0x41   : > { %431 = vperm.xlu1 %2205, %v280_v27   ;;  %426 = vperm.xlu0 %2204, %v279_v28  }
  0x45   : > { %441 = vperm.xlu1 %2205, %v282_v29   ;;  %436 = vperm.xlu0 %2204, %v281_v30  }
  0x49   : > { %451 = vperm.xlu1 %2205, %v284_v31   ;;  %446 = vperm.xlu0 %2204, %v283_v32  }
  0x4d   : > { %461 = vperm.xlu1 %2205, %v286_v33   ;;  %456 = vperm.xlu0 %2204, %v285_v34  }
  0x8c   : > { %v317_v37 = vpop.permute.xlu1 %316  ;;  %v307_v38 = vpop.permute.xlu0 %306 }
  0x8d   : > { %v470_v39 = vmul.f32 %v2301_v35, %v317_v37  ;;  %v468_v40 = vmul.f32 %v2301_v35, %v307_v38 }
  0x8f   : > { %v504_v41 = vadd.f32 %v2306_v36, %v468_v40  ;;  %v506_v42 = vadd.f32 %v2306_v36, %v470_v39 }
  0x90   : > { %v322_v43 = vpop.permute.xlu1 %321  ;;  %v312_v44 = vpop.permute.xlu0 %311 }
  0x91   : > { %v471_v45 = vmul.f32 %v2301_v35, %v322_v43  ;;  %v469_v46 = vmul.f32 %v2301_v35, %v312_v44  ;;  %v536_v47 = vmax.f32 %v504_v41, 0.0  ;;  %v538_v49 = vmax.f32 %v506_v42, 0.0 }
  0x93   : > { %v505_v48 = vadd.f32 %v2306_v36, %v469_v46  ;;  %2124 = vmatprep.mubr.msk.f32.mxu0 %vm568_vm0, %v536_v47  ;;  %v507_v50 = vadd.f32 %v2306_v36, %v471_v45 }
  0x94   : > { %v332_v51 = vpop.permute.xlu1 %331  ;;  %v327_v52 = vpop.permute.xlu0 %326 }
  0x95   : > { %v537_v53 = vmax.f32 %v505_v48, 0.0  ;;  %v473_v54 = vmul.f32 %v2301_v35, %v332_v51  ;;  %v472_v55 = vmul.f32 %v2301_v35, %v327_v52  ;;  %v539_v57 = vmax.f32 %v507_v50, 0.0 }
  0x97   : > { %v508_v56 = vadd.f32 %v2306_v36, %v472_v55  ;;  %2125 = vmatmul.mubr.msk.f32.vlgmr.msra.gmra.mxu0 %vm568_vm0, %v537_v53  ;;  %v509_v60 = vadd.f32 %v2306_v36, %v473_v54 }
  0x98   : > { %v342_v58 = vpop.permute.xlu1 %341  ;;  %2127 = vmatprep.mubr.msk.f32.mxu0 %vm568_vm0, %v538_v49  ;;  %v337_v59 = vpop.permute.xlu0 %336 }
  0x99   : > { %v540_v61 = vmax.f32 %v508_v56, 0.0  ;;  %v475_v62 = vmul.f32 %v2301_v35, %v342_v58  ;;  %v474_v63 = vmul.f32 %v2301_v35, %v337_v59  ;;  %v541_v4 = vmax.f32 %v509_v60, 0.0 }
  0x9b   : > { %v510_v0 = vadd.f32 %v2306_v36, %v474_v63  ;;  %2128 = vmatmul.mubr.msk.f32.gmra.mxu0 %vm568_vm0, %v539_v57  ;;  %v511_v1 = vadd.f32 %v2306_v36, %v475_v62 }
  0x9c   : > { %v352_v2 = vpop.permute.xlu1 %351  ;;  %2130 = vmatprep.mubr.msk.f32.mxu0 %vm568_vm0, %v540_v61  ;;  %v347_v3 = vpop.permute.xlu0 %346 }
  0x9d   : > { %v542_v5 = vmax.f32 %v510_v0, 0.0  ;;  %v477_v6 = vmul.f32 %v2301_v35, %v352_v2  ;;  %v476_v7 = vmul.f32 %v2301_v35, %v347_v3  ;;  %v543_v9 = vmax.f32 %v511_v1, 0.0 }
  0x9f   : > { %v512_v8 = vadd.f32 %v2306_v36, %v476_v7  ;;  %2131 = vmatmul.mubr.msk.f32.gmra.mxu0 %vm568_vm0, %v541_v4  ;;  %v513_v12 = vadd.f32 %v2306_v36, %v477_v6 }
  0xa0   : > { %v362_v10 = vpop.permute.xlu1 %361  ;;  %2133 = vmatprep.mubr.msk.f32.mxu0 %vm568_vm0, %v542_v5  ;;  %v357_v11 = vpop.permute.xlu0 %356 }
  0xa1   : > { %v544_v13 = vmax.f32 %v512_v8, 0.0  ;;  %v479_v14 = vmul.f32 %v2301_v35, %v362_v10  ;;  %v478_v15 = vmul.f32 %v2301_v35, %v357_v11  ;;  %v545_v20 = vmax.f32 %v513_v12, 0.0 }
  0xa3   : > { %v514_v16 = vadd.f32 %v2306_v36, %v478_v15  ;;  %2134 = vmatmul.mubr.msk.f32.gmra.mxu0 %vm568_vm0, %v543_v9  ;;  %v515_v17 = vadd.f32 %v2306_v36, %v479_v14 }
  0xa4   : > { %v372_v18 = vpop.permute.xlu1 %371  ;;  %2136 = vmatprep.mubr.msk.f32.mxu0 %vm568_vm0, %v544_v13  ;;  %v367_v19 = vpop.permute.xlu0 %366 }
  0xa5   : > { %v546_v21 = vmax.f32 %v514_v16, 0.0  ;;  %v481_v22 = vmul.f32 %v2301_v35, %v372_v18  ;;  %v480_v23 = vmul.f32 %v2301_v35, %v367_v19  ;;  %v547_v25 = vmax.f32 %v515_v17, 0.0 }
  0xa7   : > { %v516_v24 = vadd.f32 %v2306_v36, %v480_v23  ;;  %2137 = vmatmul.mubr.msk.f32.gmra.mxu0 %vm568_vm0, %v545_v20  ;;  %v517_v28 = vadd.f32 %v2306_v36, %v481_v22 }
  0xa8   : > { %v382_v26 = vpop.permute.xlu1 %381  ;;  %2139 = vmatprep.mubr.msk.f32.mxu0 %vm568_vm0, %v546_v21  ;;  %v377_v27 = vpop.permute.xlu0 %376 }
  0xa9   : > { %v548_v29 = vmax.f32 %v516_v24, 0.0  ;;  %v483_v30 = vmul.f32 %v2301_v35, %v382_v26  ;;  %v482_v31 = vmul.f32 %v2301_v35, %v377_v27  ;;  %v549_v38 = vmax.f32 %v517_v28, 0.0 }
  0xab   : > { %v518_v32 = vadd.f32 %v2306_v36, %v482_v31  ;;  %2140 = vmatmul.mubr.msk.f32.gmra.mxu0 %vm568_vm0, %v547_v25  ;;  %v519_v33 = vadd.f32 %v2306_v36, %v483_v30 }
  0xac   : > { %v392_v34 = vpop.permute.xlu1 %391  ;;  %2142 = vmatprep.mubr.msk.f32.mxu0 %vm568_vm0, %v548_v29  ;;  %v387_v37 = vpop.permute.xlu0 %386 }
  0xad   : > { %v550_v39 = vmax.f32 %v518_v32, 0.0  ;;  %v485_v40 = vmul.f32 %v2301_v35, %v392_v34  ;;  %v484_v41 = vmul.f32 %v2301_v35, %v387_v37  ;;  %v551_v43 = vmax.f32 %v519_v33, 0.0 }
  0xaf   : > { %v520_v42 = vadd.f32 %v2306_v36, %v484_v41  ;;  %2143 = vmatmul.mubr.msk.f32.gmra.mxu0 %vm568_vm0, %v549_v38  ;;  %v521_v46 = vadd.f32 %v2306_v36, %v485_v40  ;;  %v3121_v41 = vmov 0.0  }
  0xb0   : > { %v402_v44 = vpop.permute.xlu1 %401  ;;  %2145 = vmatprep.mubr.msk.f32.mxu0 %vm568_vm0, %v550_v39  ;;  %v397_v45 = vpop.permute.xlu0 %396  ;;  %890 = vmatprep.subr.mxu1 %v3121_v41 }
  0xb1   : > { %v552_v47 = vmax.f32 %v520_v42, 0.0  ;;  %v487_v48 = vmul.f32 %v2301_v35, %v402_v44  ;;  %v486_v49 = vmul.f32 %v2301_v35, %v397_v45  ;;  %v553_v54 = vmax.f32 %v521_v46, 0.0  ;;  %1187 = vmatprep.subr.mxu0 %v3121_v41 }
  0xb3   : > { %v522_v50 = vadd.f32 %v2306_v36, %v486_v49  ;;  %2146 = vmatmul.mubr.msk.f32.gmra.mxu0 %vm568_vm0, %v551_v43  ;;  %v523_v51 = vadd.f32 %v2306_v36, %v487_v48 }
  0xb4   : > { %v412_v52 = vpop.permute.xlu1 %411  ;;  %2148 = vmatprep.mubr.msk.f32.mxu0 %vm568_vm0, %v552_v47  ;;  %v407_v53 = vpop.permute.xlu0 %406 }
  0xb5   : > { %v554_v55 = vmax.f32 %v522_v50, 0.0  ;;  %v489_v56 = vmul.f32 %v2301_v35, %v412_v52  ;;  %v488_v57 = vmul.f32 %v2301_v35, %v407_v53  ;;  %v555_v59 = vmax.f32 %v523_v51, 0.0 }
  0xb7   : > { %v524_v58 = vadd.f32 %v2306_v36, %v488_v57  ;;  %2149 = vmatmul.mubr.msk.f32.gmra.mxu0 %vm568_vm0, %v553_v54  ;;  %v525_v62 = vadd.f32 %v2306_v36, %v489_v56 }
  0xb8   : > { %v422_v60 = vpop.permute.xlu1 %421  ;;  %2151 = vmatprep.mubr.msk.f32.mxu0 %vm568_vm0, %v554_v55  ;;  %v417_v61 = vpop.permute.xlu0 %416 }
  0xb9   : > { %v556_v63 = vmax.f32 %v524_v58, 0.0  ;;  %v491_v0 = vmul.f32 %v2301_v35, %v422_v60  ;;  %v490_v1 = vmul.f32 %v2301_v35, %v417_v61  ;;  %v557_v6 = vmax.f32 %v525_v62, 0.0 }
  0xbb   : > { %v526_v2 = vadd.f32 %v2306_v36, %v490_v1  ;;  %2152 = vmatmul.mubr.msk.f32.gmra.mxu0 %vm568_vm0, %v555_v59  ;;  %v527_v3 = vadd.f32 %v2306_v36, %v491_v0 }
  0xbc   : > { %v432_v4 = vpop.permute.xlu1 %431  ;;  %2154 = vmatprep.mubr.msk.f32.mxu0 %vm568_vm0, %v556_v63  ;;  %v427_v5 = vpop.permute.xlu0 %426 }
  0xbd   : > { %v558_v7 = vmax.f32 %v526_v2, 0.0  ;;  %v493_v8 = vmul.f32 %v2301_v35, %v432_v4  ;;  %v492_v9 = vmul.f32 %v2301_v35, %v427_v5  ;;  %v559_v11 = vmax.f32 %v527_v3, 0.0 }
  0xbf   : > { %v528_v10 = vadd.f32 %v2306_v36, %v492_v9  ;;  %2155 = vmatmul.mubr.msk.f32.gmra.mxu0 %vm568_vm0, %v557_v6  ;;  %v529_v14 = vadd.f32 %v2306_v36, %v493_v8  ;;  %v2449_v9 = vld [vmem:[%s2410_s29] sm:$0xff] }
  0xc0   : > { %v442_v12 = vpop.permute.xlu1 %441  ;;  %2157 = vmatprep.mubr.msk.f32.mxu0 %vm568_vm0, %v558_v7  ;;  %v437_v13 = vpop.permute.xlu0 %436 }
  0xc1   : > { %v560_v15 = vmax.f32 %v528_v10, 0.0  ;;  %v495_v16 = vmul.f32 %v2301_v35, %v442_v12  ;;  %v494_v17 = vmul.f32 %v2301_v35, %v437_v13  ;;  %v561_v22 = vmax.f32 %v529_v14, 0.0  ;;  %v2453_v10 = vld [vmem:[%s2410_s29 + $0x18] sm:$0xff]  ;;  %v2463_v12 = vld [vmem:[%s2410_s29 + $0x28] sm:$0xff]  ;;  %v2468_v13 = vld [vmem:[%s2410_s29 + $0x20] sm:$0xff] }
  0xc2   : > { %v2471_v14 = vld [vmem:[%s2410_s29 + $0x38] sm:$0xff] }
  0xc3   : > { %v530_v18 = vadd.f32 %v2306_v36, %v494_v17  ;;  %2158 = vmatmul.mubr.msk.f32.gmra.mxu0 %vm568_vm0, %v559_v11  ;;  %v531_v19 = vadd.f32 %v2306_v36, %v495_v16  ;;  %v2460_v11 = vld [vmem:[%s2410_s29 + $0x10] sm:$0xff]  ;;  %v2479_v16 = vld [vmem:[%s2410_s29 + $0x48] sm:$0xff]  ;;  %v2484_v17 = vld [vmem:[%s2410_s29 + $0x40] sm:$0xff] }
  0xc4   : > { %v452_v20 = vpop.permute.xlu1 %451  ;;  %2160 = vmatprep.mubr.msk.f32.mxu0 %vm568_vm0, %v560_v15  ;;  %v447_v21 = vpop.permute.xlu0 %446  ;;  %v2476_v15 = vld [vmem:[%s2410_s29 + $0x30] sm:$0xff] }
  0xc5   : > { %v562_v23 = vmax.f32 %v530_v18, 0.0  ;;  %v497_v24 = vmul.f32 %v2301_v35, %v452_v20  ;;  %v496_v25 = vmul.f32 %v2301_v35, %v447_v21  ;;  %v563_v27 = vmax.f32 %v531_v19, 0.0  ;;  %v2487_v18 = vld [vmem:[%s2410_s29 + $0x58] sm:$0xff]  ;;  %v2492_v19 = vld [vmem:[%s2410_s29 + $0x50] sm:$0xff]  ;;  %v2495_v20 = vld [vmem:[%s2410_s29 + $0x68] sm:$0xff] }
  0xc6   : > { %v2500_v21 = vld [vmem:[%s2410_s29 + $0x60] sm:$0xff] }
  0xc7   : > { %v532_v26 = vadd.f32 %v2306_v36, %v496_v25  ;;  %2161 = vmatmul.mubr.msk.f32.gmra.mxu0 %vm568_vm0, %v561_v22  ;;  %v533_v30 = vadd.f32 %v2306_v36, %v497_v24  ;;  %v2503_v22 = vld [vmem:[%s2410_s29 + $0x78] sm:$0xff]  ;;  %v2511_v24 = vld [vmem:[%s2410_s29 + $0x88] sm:$0xff]  ;;  %v2516_v25 = vld [vmem:[%s2410_s29 + $0x80] sm:$0xff] }
  0xc8   : > { %v462_v28 = vpop.permute.xlu1 %461  ;;  %2163 = vmatprep.mubr.msk.f32.mxu0 %vm568_vm0, %v562_v23  ;;  %v457_v29 = vpop.permute.xlu0 %456  ;;  %v2508_v23 = vld [vmem:[%s2410_s29 + $0x70] sm:$0xff] }
  0xc9   : > { %v564_v31 = vmax.f32 %v532_v26, 0.0  ;;  %v499_v32 = vmul.f32 %v2301_v35, %v462_v28  ;;  %v498_v33 = vmul.f32 %v2301_v35, %v457_v29  ;;  %v565_v38 = vmax.f32 %v533_v30, 0.0  ;;  %v190_v35 = vld [vmem:[%s2410_s29 + $0x8] sm:$0xff]  ;;  %v2519_v26 = vld [vmem:[%s2410_s29 + $0x98] sm:$0xff]  ;;  %v2532_v29 = vld [vmem:[%s2410_s29 + $0xa0] sm:$0xff] }
  0xca   : > { %954 = vmatprep.mubr.f32.mxu1 %v190_v35  ;;  %v2527_v28 = vld [vmem:[%s2410_s29 + $0xa8] sm:$0xff]  ;;  %v2535_v30 = vld [vmem:[%s2410_s29 + $0xb8] sm:$0xff] }
  0xcb   : > { %v535_v34 = vadd.f32 %v2306_v36, %v499_v32  ;;  %v534_v37 = vadd.f32 %v2306_v36, %v498_v33  ;;  %2164 = vmatmul.mubr.msk.f32.gmra.mxu0 %vm568_vm0, %v563_v27  ;;  %v2524_v27 = vld [vmem:[%s2410_s29 + $0x90] sm:$0xff]  ;;  %v2543_v32 = vld [vmem:[%s2410_s29 + $0xc8] sm:$0xff]  ;;  %v2548_v33 = vld [vmem:[%s2410_s29 + $0xc0] sm:$0xff] }
  0xcc   : > { %2166 = vmatprep.mubr.msk.f32.mxu0 %vm568_vm0, %v564_v31  ;;  %v2540_v31 = vld [vmem:[%s2410_s29 + $0xb0] sm:$0xff] }
  0xcd   : > { %v566_v39 = vmax.f32 %v534_v37, 0.0  ;;  %v567_v40 = vmax.f32 %v535_v34, 0.0  ;;  %v2551_v34 = vld [vmem:[%s2410_s29 + $0xd8] sm:$0xff]  ;;  %v2556_v37 = vld [vmem:[%s2410_s29 + $0xd0] sm:$0xff] }
  0xcf   : > { %2167 = vmatmul.mubr.msk.f32.gmra.mxu0 %vm568_vm0, %v565_v38  ;;  %v2559_v38 = vld [vmem:[%s2410_s29 + $0xe8] sm:$0xff] }
  0xd0   : > { %2169 = vmatprep.mubr.msk.f32.mxu0 %vm568_vm0, %v566_v39  ;;  %v2564_v39 = vld [vmem:[%s2410_s29 + $0xe0] sm:$0xff] }
  0xd3   : > { %2170 = vmatmul.mubr.msk.f32.gmra.mxu0 %vm568_vm0, %v567_v40  ;;  %v2567_v40 = vld [vmem:[%s2410_s29 + $0xf8] sm:$0xff] }
  0xd4   : > { %1251 = vmatprep.mubr.f32.mxu0 %v190_v35  ;;  %v2572_v35 = vld [vmem:[%s2410_s29 + $0xf0] sm:$0xff] }
 0x157   : > { %v2126_v36 = vpop.f32.mrf.mxu0 }
 0x159   : > { %v731_v42 = vpop.f32.mrf.mxu0 }
 0x15b   : > { %v2129_v43 = vpop.f32.mrf.mxu0 }
 0x15d   : > { %v741_v44 = vpop.f32.mrf.mxu0 }
 0x15f   : > { %v2132_v45 = vpop.f32.mrf.mxu0 }
 0x161   : > { %v751_v46 = vpop.f32.mrf.mxu0 }
 0x163   : > { %v2135_v47 = vpop.f32.mrf.mxu0 }
 0x165   : > { %v761_v48 = vpop.f32.mrf.mxu0 }
 0x167   : > { %v2138_v49 = vpop.f32.mrf.mxu0 }
 0x169   : > { %v771_v50 = vpop.f32.mrf.mxu0 }
 0x16b   : > { %v2141_v51 = vpop.f32.mrf.mxu0 }
 0x16d   : > { %v781_v52 = vpop.f32.mrf.mxu0 }
 0x16f   : > { %v2144_v53 = vpop.f32.mrf.mxu0 }
 0x171   : > { %v791_v54 = vpop.f32.mrf.mxu0 }
 0x173   : > { %v2147_v55 = vpop.f32.mrf.mxu0 }
 0x174   : > { %891 = vmatpush1.msra.mxu1 %v2147_v55  ;;  %v2631_v55 = vld [vmem:[%s2410_s29 + $0x178] sm:$0xff] }
 0x175   : > { %v801_v56 = vpop.f32.mrf.mxu0  ;;  %892 = vmatprep.subr.mxu1 %v3121_v41  ;;  %3161 = vst [vmem:[#allocation12_spill] sm:$0xff] %v2631_v55 }
 0x176   : > { %893 = vmatpush1.msra.mxu1 %v801_v56  ;;  %v2636_v56 = vld [vmem:[%s2410_s29 + $0x170] sm:$0xff] }
 0x177   : > { %v2414_v57 = vpop.f32.mrf.mxu0  ;;  %894 = vmatprep.subr.mxu1 %v3121_v41  ;;  %3162 = vst [vmem:[#allocation13_spill] sm:$0xff] %v2636_v56 }
 0x178   : > { %895 = vmatpush1.msra.mxu1 %v2144_v53  ;;  %v2623_v53 = vld [vmem:[%s2410_s29 + $0x168] sm:$0xff] }
 0x179   : > { %v2417_v58 = vpop.f32.mrf.mxu0  ;;  %896 = vmatprep.subr.mxu1 %v3121_v41  ;;  %3159 = vst [vmem:[#allocation10_spill] sm:$0xff] %v2623_v53 }
 0x17a   : > { %897 = vmatpush1.msra.mxu1 %v791_v54  ;;  %v2628_v54 = vld [vmem:[%s2410_s29 + $0x160] sm:$0xff] }
 0x17b   : > { %v2153_v59 = vpop.f32.mrf.mxu0  ;;  %898 = vmatprep.subr.mxu1 %v3121_v41  ;;  %3160 = vst [vmem:[#allocation11_spill] sm:$0xff] %v2628_v54 }
 0x17c   : > { %899 = vmatpush1.msra.mxu1 %v2141_v51  ;;  %v2615_v51 = vld [vmem:[%s2410_s29 + $0x158] sm:$0xff] }
 0x17d   : > { %v821_v60 = vpop.f32.mrf.mxu0  ;;  %900 = vmatprep.subr.mxu1 %v3121_v41  ;;  %3157 = vst [vmem:[#allocation8_spill] sm:$0xff] %v2615_v51 }
 0x17e   : > { %901 = vmatpush1.msra.mxu1 %v781_v52  ;;  %v2620_v52 = vld [vmem:[%s2410_s29 + $0x150] sm:$0xff] }
 0x17f   : > { %v2156_v61 = vpop.f32.mrf.mxu0  ;;  %902 = vmatprep.subr.mxu1 %v3121_v41  ;;  %3158 = vst [vmem:[#allocation9_spill] sm:$0xff] %v2620_v52 }
 0x180   : > { %903 = vmatpush1.msra.mxu1 %v2138_v49  ;;  %v2607_v49 = vld [vmem:[%s2410_s29 + $0x148] sm:$0xff] }
 0x181   : > { %v831_v62 = vpop.f32.mrf.mxu0  ;;  %904 = vmatprep.subr.mxu1 %v3121_v41  ;;  %3155 = vst [vmem:[#allocation6_spill] sm:$0xff] %v2607_v49 }
 0x182   : > { %905 = vmatpush1.msra.mxu1 %v771_v50  ;;  %v2612_v50 = vld [vmem:[%s2410_s29 + $0x140] sm:$0xff] }
 0x183   : > { %v2159_v63 = vpop.f32.mrf.mxu0  ;;  %906 = vmatprep.subr.mxu1 %v3121_v41  ;;  %3156 = vst [vmem:[#allocation7_spill] sm:$0xff] %v2612_v50 }
 0x184   : > { %907 = vmatpush1.msra.mxu1 %v2135_v47  ;;  %v2599_v47 = vld [vmem:[%s2410_s29 + $0x138] sm:$0xff] }
 0x185   : > { %v841_v0 = vpop.f32.mrf.mxu0  ;;  %908 = vmatprep.subr.mxu1 %v3121_v41  ;;  %3153 = vst [vmem:[#allocation4_spill] sm:$0xff] %v2599_v47 }
 0x186   : > { %909 = vmatpush1.msra.mxu1 %v761_v48  ;;  %v2604_v48 = vld [vmem:[%s2410_s29 + $0x130] sm:$0xff] }
 0x187   : > { %v2162_v1 = vpop.f32.mrf.mxu0  ;;  %910 = vmatprep.subr.mxu1 %v3121_v41  ;;  %3154 = vst [vmem:[#allocation5_spill] sm:$0xff] %v2604_v48 }
 0x188   : > { %911 = vmatpush1.msra.mxu1 %v2132_v45  ;;  %v2591_v45 = vld [vmem:[%s2410_s29 + $0x128] sm:$0xff] }
 0x189   : > { %v851_v2 = vpop.f32.mrf.mxu0  ;;  %912 = vmatprep.subr.mxu1 %v3121_v41  ;;  %3151 = vst [vmem:[#allocation2_spill] sm:$0xff] %v2591_v45 }
 0x18a   : > { %913 = vmatpush1.msra.mxu1 %v751_v46  ;;  %v2596_v46 = vld [vmem:[%s2410_s29 + $0x120] sm:$0xff] }
 0x18b   : > { %v2165_v3 = vpop.f32.mrf.mxu0  ;;  %914 = vmatprep.subr.mxu1 %v3121_v41  ;;  %3152 = vst [vmem:[#allocation3_spill] sm:$0xff] %v2596_v46 }
 0x18c   : > { %915 = vmatpush1.msra.mxu1 %v2129_v43  ;;  %v2583_v43 = vld [vmem:[%s2410_s29 + $0x118] sm:$0xff] }
 0x18d   : > { %v861_v4 = vpop.f32.mrf.mxu0  ;;  %916 = vmatprep.subr.mxu1 %v3121_v41 }
 0x18e   : > { %917 = vmatpush1.msra.mxu1 %v741_v44  ;;  %v2588_v44 = vld [vmem:[%s2410_s29 + $0x110] sm:$0xff] }
 0x18f   : > { %v2168_v5 = vpop.f32.mrf.mxu0  ;;  %918 = vmatprep.subr.mxu1 %v3121_v41 }
 0x190   : > { %919 = vmatpush1.msra.mxu1 %v2126_v36  ;;  %v2575_v36 = vld [vmem:[%s2410_s29 + $0x108] sm:$0xff] }
 0x191   : > { %v871_v6 = vpop.f32.mrf.mxu0  ;;  %920 = vmatprep.subr.mxu1 %v3121_v41 }
 0x192   : > { %921 = vmatpush1.msra.mxu1 %v731_v42  ;;  %v2580_v42 = vld [vmem:[%s2410_s29 + $0x100] sm:$0xff] }
 0x193   : > { %v2171_v7 = vpop.f32.mrf.mxu0  ;;  %922 = vmatprep.subr.mxu1 %v3121_v41 }
 0x194   : > { %923 = vmatpush2.msra.mxu1 %v2171_v7  ;;  %v2695_v7 = vld [vmem:[%s2410_s29 + $0x1f8] sm:$0xff] }
 0x195   : > { %v881_v8 = vpop.f32.mrf.mxu0  ;;  %924 = vmatprep.subr.mxu1 %v3121_v41  ;;  %3177 = vst [vmem:[#allocation28_spill] sm:$0xff] %v2695_v7 }
 0x196   : > { %925 = vmatpush2.msra.mxu1 %v881_v8  ;;  %v2700_v8 = vld [vmem:[%s2410_s29 + $0x1f0] sm:$0xff] }
 0x197   : > { %926 = vmatprep.subr.mxu1 %v3121_v41  ;;  %3178 = vst [vmem:[#allocation29_spill] sm:$0xff] %v2700_v8 }
 0x198   : > { %927 = vmatpush2.msra.mxu1 %v2168_v5  ;;  %v2687_v5 = vld [vmem:[%s2410_s29 + $0x1e8] sm:$0xff] }
 0x199   : > { %928 = vmatprep.subr.mxu1 %v3121_v41  ;;  %3175 = vst [vmem:[#allocation26_spill] sm:$0xff] %v2687_v5 }
 0x19a   : > { %929 = vmatpush2.msra.mxu1 %v871_v6  ;;  %v2692_v6 = vld [vmem:[%s2410_s29 + $0x1e0] sm:$0xff] }
 0x19b   : > { %930 = vmatprep.subr.mxu1 %v3121_v41  ;;  %3176 = vst [vmem:[#allocation27_spill] sm:$0xff] %v2692_v6 }
 0x19c   : > { %931 = vmatpush2.msra.mxu1 %v2165_v3  ;;  %v2679_v3 = vld [vmem:[%s2410_s29 + $0x1d8] sm:$0xff] }
 0x19d   : > { %932 = vmatprep.subr.mxu1 %v3121_v41  ;;  %3173 = vst [vmem:[#allocation24_spill] sm:$0xff] %v2679_v3 }
 0x19e   : > { %933 = vmatpush2.msra.mxu1 %v861_v4  ;;  %v2684_v4 = vld [vmem:[%s2410_s29 + $0x1d0] sm:$0xff] }
 0x19f   : > { %934 = vmatprep.subr.mxu1 %v3121_v41  ;;  %3174 = vst [vmem:[#allocation25_spill] sm:$0xff] %v2684_v4 }
 0x1a0   : > { %935 = vmatpush2.msra.mxu1 %v2162_v1  ;;  %v2671_v1 = vld [vmem:[%s2410_s29 + $0x1c8] sm:$0xff] }
 0x1a1   : > { %936 = vmatprep.subr.mxu1 %v3121_v41  ;;  %3171 = vst [vmem:[#allocation22_spill] sm:$0xff] %v2671_v1 }
 0x1a2   : > { %937 = vmatpush2.msra.mxu1 %v851_v2  ;;  %v2676_v2 = vld [vmem:[%s2410_s29 + $0x1c0] sm:$0xff] }
 0x1a3   : > { %938 = vmatprep.subr.mxu1 %v3121_v41  ;;  %3172 = vst [vmem:[#allocation23_spill] sm:$0xff] %v2676_v2 }
 0x1a4   : > { %939 = vmatpush2.msra.mxu1 %v2159_v63  ;;  %v2663_v63 = vld [vmem:[%s2410_s29 + $0x1b8] sm:$0xff] }
 0x1a5   : > { %940 = vmatprep.subr.mxu1 %v3121_v41  ;;  %3169 = vst [vmem:[#allocation20_spill] sm:$0xff] %v2663_v63 }
 0x1a6   : > { %941 = vmatpush2.msra.mxu1 %v841_v0  ;;  %v2668_v0 = vld [vmem:[%s2410_s29 + $0x1b0] sm:$0xff] }
 0x1a7   : > { %942 = vmatprep.subr.mxu1 %v3121_v41  ;;  %3170 = vst [vmem:[#allocation21_spill] sm:$0xff] %v2668_v0 }
 0x1a8   : > { %943 = vmatpush2.msra.mxu1 %v2156_v61  ;;  %v2655_v61 = vld [vmem:[%s2410_s29 + $0x1a8] sm:$0xff] }
 0x1a9   : > { %944 = vmatprep.subr.mxu1 %v3121_v41  ;;  %3167 = vst [vmem:[#allocation18_spill] sm:$0xff] %v2655_v61 }
 0x1aa   : > { %945 = vmatpush2.msra.mxu1 %v831_v62  ;;  %v2660_v62 = vld [vmem:[%s2410_s29 + $0x1a0] sm:$0xff] }
 0x1ab   : > { %946 = vmatprep.subr.mxu1 %v3121_v41  ;;  %3168 = vst [vmem:[#allocation19_spill] sm:$0xff] %v2660_v62 }
 0x1ac   : > { %947 = vmatpush2.msra.mxu1 %v2153_v59  ;;  %v2647_v59 = vld [vmem:[%s2410_s29 + $0x198] sm:$0xff] }
 0x1ad   : > { %948 = vmatprep.subr.mxu1 %v3121_v41  ;;  %3165 = vst [vmem:[#allocation16_spill] sm:$0xff] %v2647_v59 }
 0x1ae   : > { %949 = vmatpush2.msra.mxu1 %v821_v60  ;;  %v2652_v60 = vld [vmem:[%s2410_s29 + $0x190] sm:$0xff] }
 0x1af   : > { %950 = vmatprep.subr.mxu1 %v3121_v41  ;;  %3166 = vst [vmem:[#allocation17_spill] sm:$0xff] %v2652_v60 }
 0x1b0   : > { %951 = vmatpush2.msra.mxu1 %v2414_v57  ;;  %v2639_v57 = vld [vmem:[%s2410_s29 + $0x188] sm:$0xff] }
 0x1b1   : > { %952 = vmatprep.subr.mxu1 %v3121_v41  ;;  %3163 = vst [vmem:[#allocation14_spill] sm:$0xff] %v2639_v57 }
 0x1b2   : > { %953 = vmatpush2.msra.mxu1 %v2417_v58  ;;  %v2644_v58 = vld [vmem:[%s2410_s29 + $0x180] sm:$0xff] }
 0x1b3   : > { %955 = vmatmul.mubr.f32.vlgmr.msra.gmra.mxu1 %v2449_v9  ;;  %2172 = vmatprep.subr.mxu1 %v3121_v41  ;;  %3164 = vst [vmem:[#allocation15_spill] sm:$0xff] %v2644_v58 }
 0x1b4   : > { %959 = vmatprep.mubr.f32.mxu1 %v2453_v10 }
 0x1b7   : > { %960 = vmatmul.mubr.f32.gmra.mxu1 %v2460_v11 }
 0x1b8   : > { %964 = vmatprep.mubr.f32.mxu1 %v2463_v12 }
 0x1bb   : > { %965 = vmatmul.mubr.f32.gmra.mxu1 %v2468_v13 }
 0x1bc   : > { %969 = vmatprep.mubr.f32.mxu1 %v2471_v14 }
 0x1bf   : > { %970 = vmatmul.mubr.f32.gmra.mxu1 %v2476_v15 }
 0x1c0   : > { %974 = vmatprep.mubr.f32.mxu1 %v2479_v16 }
 0x1c3   : > { %975 = vmatmul.mubr.f32.gmra.mxu1 %v2484_v17 }
 0x1c4   : > { %979 = vmatprep.mubr.f32.mxu1 %v2487_v18 }
 0x1c7   : > { %980 = vmatmul.mubr.f32.gmra.mxu1 %v2492_v19 }
 0x1c8   : > { %984 = vmatprep.mubr.f32.mxu1 %v2495_v20 }
 0x1cb   : > { %985 = vmatmul.mubr.f32.gmra.mxu1 %v2500_v21 }
 0x1cc   : > { %989 = vmatprep.mubr.f32.mxu1 %v2503_v22 }
 0x1cf   : > { %990 = vmatmul.mubr.f32.gmra.mxu1 %v2508_v23 }
 0x1d0   : > { %994 = vmatprep.mubr.f32.mxu1 %v2511_v24 }
 0x1d3   : > { %995 = vmatmul.mubr.f32.gmra.mxu1 %v2516_v25 }
 0x1d4   : > { %999 = vmatprep.mubr.f32.mxu1 %v2519_v26 }
 0x1d7   : > { %1000 = vmatmul.mubr.f32.gmra.mxu1 %v2524_v27 }
 0x1d8   : > { %1004 = vmatprep.mubr.f32.mxu1 %v2527_v28 }
 0x1db   : > { %1005 = vmatmul.mubr.f32.gmra.mxu1 %v2532_v29 }
 0x1dc   : > { %1009 = vmatprep.mubr.f32.mxu1 %v2535_v30 }
 0x1df   : > { %1010 = vmatmul.mubr.f32.gmra.mxu1 %v2540_v31 }
 0x1e0   : > { %1014 = vmatprep.mubr.f32.mxu1 %v2543_v32 }
 0x1e3   : > { %1015 = vmatmul.mubr.f32.gmra.mxu1 %v2548_v33 }
 0x1e4   : > { %1019 = vmatprep.mubr.f32.mxu1 %v2551_v34 }
 0x1e7   : > { %1020 = vmatmul.mubr.f32.gmra.mxu1 %v2556_v37 }
 0x1e8   : > { %1024 = vmatprep.mubr.f32.mxu1 %v2559_v38 }
 0x1eb   : > { %1025 = vmatmul.mubr.f32.gmra.mxu1 %v2564_v39 }
 0x1ec   : > { %1029 = vmatprep.mubr.f32.mxu1 %v2567_v40 }
 0x1ef   : > { %1030 = vmatmul.mubr.f32.gmra.mxu1 %v2572_v35 }
 0x1f0   : > { %1034 = vmatprep.mubr.f32.mxu1 %v2575_v36 }
 0x1f3   : > { %1035 = vmatmul.mubr.f32.gmra.mxu1 %v2580_v42 }
 0x1f4   : > { %1039 = vmatprep.mubr.f32.mxu1 %v2583_v43 }
 0x1f7   : > { %1040 = vmatmul.mubr.f32.gmra.mxu1 %v2588_v44 }
 0x1f8   : > { %1044 = vmatprep.mubr.f32.mxu1 %v2591_v45 }
 0x1fb   : > { %1045 = vmatmul.mubr.f32.gmra.mxu1 %v2596_v46 }
 0x1fc   : > { %1049 = vmatprep.mubr.f32.mxu1 %v2599_v47  ;;  %v3179_v47 = vmov 0.0  }
 0x1ff   : > { %1050 = vmatmul.mubr.f32.gmra.mxu1 %v2604_v48 }
 0x200   : > { %1054 = vmatprep.mubr.f32.mxu1 %v2607_v49 }
 0x203   : > { %1055 = vmatmul.mubr.f32.gmra.mxu1 %v2612_v50 }
 0x204   : > { %1059 = vmatprep.mubr.f32.mxu1 %v2615_v51 }
 0x207   : > { %1060 = vmatmul.mubr.f32.gmra.mxu1 %v2620_v52 }
 0x208   : > { %1064 = vmatprep.mubr.f32.mxu1 %v2623_v53 }
 0x20b   : > { %1065 = vmatmul.mubr.f32.gmra.mxu1 %v2628_v54 }
 0x20c   : > { %1069 = vmatprep.mubr.f32.mxu1 %v2631_v55 }
 0x20f   : > { %1070 = vmatmul.mubr.f32.gmra.mxu1 %v2636_v56 }
 0x210   : > { %1074 = vmatprep.mubr.f32.mxu1 %v2639_v57 }
 0x213   : > { %1075 = vmatmul.mubr.f32.gmra.mxu1 %v2644_v58 }
 0x214   : > { %1079 = vmatprep.mubr.f32.mxu1 %v2647_v59 }
 0x217   : > { %1080 = vmatmul.mubr.f32.gmra.mxu1 %v2652_v60 }
 0x218   : > { %1084 = vmatprep.mubr.f32.mxu1 %v2655_v61 }
 0x21b   : > { %1085 = vmatmul.mubr.f32.gmra.mxu1 %v2660_v62 }
 0x21c   : > { %1089 = vmatprep.mubr.f32.mxu1 %v2663_v63 }
 0x21f   : > { %1090 = vmatmul.mubr.f32.gmra.mxu1 %v2668_v0 }
 0x220   : > { %1094 = vmatprep.mubr.f32.mxu1 %v2671_v1 }
 0x223   : > { %1095 = vmatmul.mubr.f32.gmra.mxu1 %v2676_v2 }
 0x224   : > { %1099 = vmatprep.mubr.f32.mxu1 %v2679_v3 }
 0x227   : > { %1100 = vmatmul.mubr.f32.gmra.mxu1 %v2684_v4 }
 0x228   : > { %1104 = vmatprep.mubr.f32.mxu1 %v2687_v5 }
 0x22b   : > { %1105 = vmatmul.mubr.f32.gmra.mxu1 %v2692_v6 }
 0x22c   : > { %1109 = vmatprep.mubr.f32.mxu1 %v2695_v7 }
 0x22f   : > { %1110 = vmatmul.mubr.f32.gmra.mxu1 %v2700_v8 }
 0x273   : > { %v2703_v41 = vpop.f32.mrf.mxu1 }
 0x275   : > { %v958_v3 = vpop.f32.mrf.mxu1 }
 0x277   : > { %v2705_v2 = vpop.f32.mrf.mxu1 }
 0x279   : > { %v963_v4 = vpop.f32.mrf.mxu1 }
 0x27b   : > { %v2707_v1 = vpop.f32.mrf.mxu1 }
 0x27d   : > { %v968_v5 = vpop.f32.mrf.mxu1 }
 0x27f   : > { %v2709_v0 = vpop.f32.mrf.mxu1 }
 0x281   : > { %v973_v63 = vpop.f32.mrf.mxu1 }
 0x283   : > { %v2711_v62 = vpop.f32.mrf.mxu1 }
 0x285   : > { %v978_v6 = vpop.f32.mrf.mxu1 }
 0x287   : > { %v2713_v7 = vpop.f32.mrf.mxu1 }
 0x289   : > { %v983_v61 = vpop.f32.mrf.mxu1 }
 0x28a   : > { %v2718_v61 = vld [vmem:[%s3119_s2 + $0x2] ss:$0 sm:$0xff] }
 0x28b   : > { %v986_v60 = vpop.f32.mrf.mxu1 }
 0x28d   : > { %v988_v8 = vpop.f32.mrf.mxu1 }
 0x28f   : > { %v991_v59 = vpop.f32.mrf.mxu1 }
 0x291   : > { %v993_v58 = vpop.f32.mrf.mxu1 }
 0x293   : > { %v996_v3 = vpop.f32.mrf.mxu1 }
 0x295   : > { %v998_v57 = vpop.f32.mrf.mxu1 }
 0x297   : > { %v1001_v56 = vpop.f32.mrf.mxu1 }
 0x299   : > { %v1003_v4 = vpop.f32.mrf.mxu1 }
 0x29b   : > { %v1006_v55 = vpop.f32.mrf.mxu1 }
 0x29d   : > { %v1008_v54 = vpop.f32.mrf.mxu1 }
 0x29f   : > { %v1011_v5 = vpop.f32.mrf.mxu1 }
 0x2a0   : > { %v1134_v46 = vadd.f32 %v2718_v61, %v1011_v5  ;;  %v1131_v5 = vadd.f32 %v2718_v61, %v996_v3  ;;  %v1128_v3 = vadd.f32 %v2718_v61, %v2713_v7 }
 0x2a1   : > { %v1013_v53 = vpop.f32.mrf.mxu1 }
 0x2a3   : > { %v1016_v52 = vpop.f32.mrf.mxu1 }
 0x2a5   : > { %v1018_v63 = vpop.f32.mrf.mxu1 }
 0x2a7   : > { %v1021_v51 = vpop.f32.mrf.mxu1 }
 0x2a8   : > { %v1136_v54 = vadd.f32 %v2718_v61, %v1021_v51  ;;  %v1133_v51 = vadd.f32 %v2718_v61, %v1006_v55 }
 0x2a9   : > { %v1023_v50 = vpop.f32.mrf.mxu1 }
 0x2aa   : > { %v1135_v50 = vadd.f32 %v2718_v61, %v1016_v52  ;;  %v1168_v45 = vmax.f32 %v1136_v54, 0.0  ;;  %v1132_v52 = vadd.f32 %v2718_v61, %v1001_v56  ;;  %v1165_v54 = vmax.f32 %v1133_v51, 0.0 }
 0x2ab   : > { %v1026_v6 = vpop.f32.mrf.mxu1  ;;  %v1163_v56 = vmax.f32 %v1131_v5, 0.0 }
 0x2ac   : > { %v1137_v57 = vadd.f32 %v2718_v61, %v1026_v6  ;;  %v1164_v55 = vmax.f32 %v1132_v52, 0.0  ;;  %v1160_v52 = vmax.f32 %v1128_v3, 0.0 }
 0x2ad   : > { %v1028_v49 = vpop.f32.mrf.mxu1 }
 0x2ae   : > { %v1169_v63 = vmax.f32 %v1137_v57, 0.0  ;;  %v1166_v57 = vmax.f32 %v1134_v46, 0.0  ;;  %v1129_v46 = vadd.f32 %v2718_v61, %v986_v60 }
 0x2af   : > { %v1031_v58 = vpop.f32.mrf.mxu1 }
 0x2b0   : > { %v1138_v8 = vadd.f32 %v2718_v61, %v1031_v58  ;;  %v1167_v58 = vmax.f32 %v1135_v50, 0.0 }
 0x2b1   : > { %v1033_v4 = vpop.f32.mrf.mxu1 }
 0x2b2   : > { %v1170_v53 = vmax.f32 %v1138_v8, 0.0 }
 0x2b3   : > { %v2723_v48 = vpop.f32.mrf.mxu1 }
 0x2b4   : > { %1188 = vmatpush1.msra.mxu0 %v1170_v53 }
 0x2b5   : > { %v1038_v49 = vpop.f32.mrf.mxu1  ;;  %1189 = vmatprep.subr.mxu0 %v3179_v47 }
 0x2b6   : > { %1190 = vmatpush1.msra.mxu0 %v1169_v63 }
 0x2b7   : > { %v2728_v6 = vpop.f32.mrf.mxu1  ;;  %1191 = vmatprep.subr.mxu0 %v3179_v47 }
 0x2b8   : > { %1192 = vmatpush1.msra.mxu0 %v1168_v45  ;;  %v1130_v45 = vadd.f32 %v2718_v61, %v991_v59  ;;  %v1127_v59 = vadd.f32 %v2718_v61, %v2711_v62 }
 0x2b9   : > { %v1043_v8 = vpop.f32.mrf.mxu1  ;;  %1193 = vmatprep.subr.mxu0 %v3179_v47 }
 0x2ba   : > { %1194 = vmatpush1.msra.mxu0 %v1167_v58  ;;  %v1162_v49 = vmax.f32 %v1130_v45, 0.0  ;;  %v1161_v58 = vmax.f32 %v1129_v46, 0.0  ;;  %v1126_v8 = vadd.f32 %v2718_v61, %v2709_v0  ;;  %v1159_v5 = vmax.f32 %v1127_v59, 0.0 }
 0x2bb   : > { %v2734_v4 = vpop.f32.mrf.mxu1  ;;  %1195 = vmatprep.subr.mxu0 %v3179_v47  ;;  %v1123_v45 = vadd.f32 %v2718_v61, %v2703_v41 }
 0x2bc   : > { %1196 = vmatpush1.msra.mxu0 %v1166_v57  ;;  %v1125_v57 = vadd.f32 %v2718_v61, %v2707_v1 }
 0x2bd   : > { %v1048_v53 = vpop.f32.mrf.mxu1  ;;  %1197 = vmatprep.subr.mxu0 %v3179_v47 }
 0x2be   : > { %1198 = vmatpush1.msra.mxu0 %v1165_v54  ;;  %v1124_v54 = vadd.f32 %v2718_v61, %v2705_v2  ;;  %v1158_v53 = vmax.f32 %v1126_v8, 0.0 }
 0x2bf   : > { %v2740_v50 = vpop.f32.mrf.mxu1  ;;  %1199 = vmatprep.subr.mxu0 %v3179_v47 }
 0x2c0   : > { %1200 = vmatpush1.msra.mxu0 %v1164_v55  ;;  %v1157_v55 = vmax.f32 %v1125_v57, 0.0  ;;  %v1156_v1 = vmax.f32 %v1124_v54, 0.0 }
 0x2c1   : > { %v1053_v63 = vpop.f32.mrf.mxu1  ;;  %1201 = vmatprep.subr.mxu0 %v3179_v47 }
 0x2c2   : > { %1202 = vmatpush1.msra.mxu0 %v1163_v56  ;;  %v1155_v63 = vmax.f32 %v1123_v45, 0.0 }
 0x2c3   : > { %v2747_v51 = vpop.f32.mrf.mxu1  ;;  %1203 = vmatprep.subr.mxu0 %v3179_v47 }
 0x2c4   : > { %1204 = vmatpush1.msra.mxu0 %v1162_v49 }
 0x2c5   : > { %v1058_v60 = vpop.f32.mrf.mxu1  ;;  %1205 = vmatprep.subr.mxu0 %v3179_v47 }
 0x2c6   : > { %1206 = vmatpush1.msra.mxu0 %v1161_v58 }
 0x2c7   : > { %v2755_v7 = vpop.f32.mrf.mxu1  ;;  %1207 = vmatprep.subr.mxu0 %v3179_v47 }
 0x2c8   : > { %1208 = vmatpush1.msra.mxu0 %v1160_v52 }
 0x2c9   : > { %v1063_v62 = vpop.f32.mrf.mxu1  ;;  %1209 = vmatprep.subr.mxu0 %v3179_v47 }
 0x2ca   : > { %1210 = vmatpush1.msra.mxu0 %v1159_v5 }
 0x2cb   : > { %v1066_v0 = vpop.f32.mrf.mxu1  ;;  %1211 = vmatprep.subr.mxu0 %v3179_v47 }
 0x2cc   : > { %1212 = vmatpush1.msra.mxu0 %v1158_v53 }
 0x2cd   : > { %v1068_v46 = vpop.f32.mrf.mxu1  ;;  %1213 = vmatprep.subr.mxu0 %v3179_v47 }
 0x2ce   : > { %1214 = vmatpush1.msra.mxu0 %v1157_v55 }
 0x2cf   : > { %v1071_v56 = vpop.f32.mrf.mxu1  ;;  %1215 = vmatprep.subr.mxu0 %v3179_v47 }
 0x2d0   : > { %1216 = vmatpush1.msra.mxu0 %v1156_v1 }
 0x2d1   : > { %v1073_v2 = vpop.f32.mrf.mxu1  ;;  %1217 = vmatprep.subr.mxu0 %v3179_v47 }
 0x2d2   : > { %1218 = vmatpush1.msra.mxu0 %v1155_v63 }
 0x2d3   : > { %v1076_v3 = vpop.f32.mrf.mxu1  ;;  %1219 = vmatprep.subr.mxu0 %v3179_v47 }
 0x2d5   : > { %v1078_v41 = vpop.f32.mrf.mxu1 }
 0x2d7   : > { %v1081_v49 = vpop.f32.mrf.mxu1 }
 0x2d9   : > { %v1083_v59 = vpop.f32.mrf.mxu1 }
 0x2db   : > { %v1086_v58 = vpop.f32.mrf.mxu1 }
 0x2dd   : > { %v1088_v60 = vpop.f32.mrf.mxu1 }
 0x2df   : > { %v1091_v8 = vpop.f32.mrf.mxu1 }
 0x2e1   : > { %v1093_v52 = vpop.f32.mrf.mxu1 }
 0x2e2   : > { %v1150_v52 = vadd.f32 %v2718_v61, %v1091_v8  ;;  %v1146_v8 = vadd.f32 %v2718_v61, %v1071_v56  ;;  %v1143_v56 = vadd.f32 %v2718_v61, %v2747_v51  ;;  %v1140_v51 = vadd.f32 %v2718_v61, %v2728_v6 }
 0x2e3   : > { %v1096_v57 = vpop.f32.mrf.mxu1 }
 0x2e4   : > { %v1151_v59 = vadd.f32 %v2718_v61, %v1096_v57  ;;  %v1147_v57 = vadd.f32 %v2718_v61, %v1076_v3  ;;  %v1178_v3 = vmax.f32 %v1146_v8, 0.0 }
 0x2e5   : > { %v1098_v5 = vpop.f32.mrf.mxu1 }
 0x2e7   : > { %v1101_v62 = vpop.f32.mrf.mxu1 }
 0x2e8   : > { %v1152_v2 = vadd.f32 %v2718_v61, %v1101_v62  ;;  %v1148_v62 = vadd.f32 %v2718_v61, %v1081_v49  ;;  %v1144_v49 = vadd.f32 %v2718_v61, %v2755_v7  ;;  %v1141_v7 = vadd.f32 %v2718_v61, %v2734_v4 }
 0x2e9   : > { %v1103_v54 = vpop.f32.mrf.mxu1 }
 0x2ea   : > { %v1184_v5 = vmax.f32 %v1152_v2, 0.0  ;;  %v1149_v54 = vadd.f32 %v2718_v61, %v1086_v58  ;;  %v1145_v58 = vadd.f32 %v2718_v61, %v1066_v0  ;;  %v1142_v0 = vadd.f32 %v2718_v61, %v2740_v50 }
 0x2eb   : > { %v1106_v53 = vpop.f32.mrf.mxu1  ;;  %v1176_v2 = vmax.f32 %v1144_v49, 0.0  ;;  %v1139_v50 = vadd.f32 %v2718_v61, %v2723_v48 }
 0x2ec   : > { %v1153_v46 = vadd.f32 %v2718_v61, %v1106_v53  ;;  %v1183_v53 = vmax.f32 %v1151_v59, 0.0  ;;  %v1174_v59 = vmax.f32 %v1142_v0, 0.0 }
 0x2ed   : > { %v1108_v45 = vpop.f32.mrf.mxu1  ;;  %v1171_v4 = vmax.f32 %v1139_v50, 0.0 }
 0x2ee   : > { %v1185_v60 = vmax.f32 %v1153_v46, 0.0  ;;  %v1182_v45 = vmax.f32 %v1150_v52, 0.0  ;;  %v1180_v46 = vmax.f32 %v1148_v62, 0.0  ;;  %v1172_v52 = vmax.f32 %v1140_v51, 0.0 }
 0x2ef   : > { %v1111_v55 = vpop.f32.mrf.mxu1 }
 0x2f0   : > { %v1154_v1 = vadd.f32 %v2718_v61, %v1111_v55  ;;  %v1181_v55 = vmax.f32 %v1149_v54, 0.0 }
 0x2f1   : > { %v1113_v63 = vpop.f32.mrf.mxu1 }
 0x2f2   : > { %v1186_v41 = vmax.f32 %v1154_v1, 0.0  ;;  %v1179_v1 = vmax.f32 %v1147_v57, 0.0  ;;  %v1177_v63 = vmax.f32 %v1145_v58, 0.0 }
 0x2f4   : > { %1220 = vmatpush2.msra.mxu0 %v1186_v41  ;;  %v1175_v41 = vmax.f32 %v1143_v56, 0.0 }
 0x2f5   : > { %1221 = vmatprep.subr.mxu0 %v3179_v47 }
 0x2f6   : > { %1222 = vmatpush2.msra.mxu0 %v1185_v60  ;;  %v1173_v60 = vmax.f32 %v1141_v7, 0.0 }
 0x2f7   : > { %1223 = vmatprep.subr.mxu0 %v3179_v47 }
 0x2f8   : > { %1224 = vmatpush2.msra.mxu0 %v1184_v5 }
 0x2f9   : > { %1225 = vmatprep.subr.mxu0 %v3179_v47 }
 0x2fa   : > { %1226 = vmatpush2.msra.mxu0 %v1183_v53 }
 0x2fb   : > { %1227 = vmatprep.subr.mxu0 %v3179_v47 }
 0x2fc   : > { %1228 = vmatpush2.msra.mxu0 %v1182_v45 }
 0x2fd   : > { %1229 = vmatprep.subr.mxu0 %v3179_v47 }
 0x2fe   : > { %1230 = vmatpush2.msra.mxu0 %v1181_v55 }
 0x2ff   : > { %1231 = vmatprep.subr.mxu0 %v3179_v47 }
 0x300   : > { %1232 = vmatpush2.msra.mxu0 %v1180_v46 }
 0x301   : > { %1233 = vmatprep.subr.mxu0 %v3179_v47 }
 0x302   : > { %1234 = vmatpush2.msra.mxu0 %v1179_v1 }
 0x303   : > { %1235 = vmatprep.subr.mxu0 %v3179_v47 }
 0x304   : > { %1236 = vmatpush2.msra.mxu0 %v1178_v3 }
 0x305   : > { %1237 = vmatprep.subr.mxu0 %v3179_v47 }
 0x306   : > { %1238 = vmatpush2.msra.mxu0 %v1177_v63 }
 0x307   : > { %1239 = vmatprep.subr.mxu0 %v3179_v47 }
 0x308   : > { %1240 = vmatpush2.msra.mxu0 %v1176_v2 }
 0x309   : > { %1241 = vmatprep.subr.mxu0 %v3179_v47 }
 0x30a   : > { %1242 = vmatpush2.msra.mxu0 %v1175_v41 }
 0x30b   : > { %1243 = vmatprep.subr.mxu0 %v3179_v47 }
 0x30c   : > { %1244 = vmatpush2.msra.mxu0 %v1174_v59 }
 0x30d   : > { %1245 = vmatprep.subr.mxu0 %v3179_v47 }
 0x30e   : > { %1246 = vmatpush2.msra.mxu0 %v1173_v60 }
 0x30f   : > { %1247 = vmatprep.subr.mxu0 %v3179_v47 }
 0x310   : > { %1248 = vmatpush2.msra.mxu0 %v1172_v52 }
 0x311   : > { %1249 = vmatprep.subr.mxu0 %v3179_v47 }
 0x312   : > { %1250 = vmatpush2.msra.mxu0 %v1171_v4 }
 0x313   : > { %1252 = vmatmul.mubr.f32.vlgmr.msra.gmra.mxu0 %v2449_v9  ;;  %v3180_v9 = vld [vmem:[#allocation2_spill] sm:$0xff] }
 0x314   : > { %1256 = vmatprep.mubr.f32.mxu0 %v2453_v10  ;;  %v3181_v10 = vld [vmem:[#allocation3_spill] sm:$0xff] }
 0x317   : > { %1257 = vmatmul.mubr.f32.gmra.mxu0 %v2460_v11  ;;  %v3182_v11 = vld [vmem:[#allocation4_spill] sm:$0xff] }
 0x318   : > { %1261 = vmatprep.mubr.f32.mxu0 %v2463_v12  ;;  %v3183_v12 = vld [vmem:[#allocation5_spill] sm:$0xff] }
 0x31b   : > { %1262 = vmatmul.mubr.f32.gmra.mxu0 %v2468_v13  ;;  %v3184_v13 = vld [vmem:[#allocation6_spill] sm:$0xff] }
 0x31c   : > { %1266 = vmatprep.mubr.f32.mxu0 %v2471_v14  ;;  %v3185_v14 = vld [vmem:[#allocation7_spill] sm:$0xff] }
 0x31f   : > { %1267 = vmatmul.mubr.f32.gmra.mxu0 %v2476_v15  ;;  %v3186_v15 = vld [vmem:[#allocation8_spill] sm:$0xff] }
 0x320   : > { %1271 = vmatprep.mubr.f32.mxu0 %v2479_v16  ;;  %v3187_v16 = vld [vmem:[#allocation9_spill] sm:$0xff] }
 0x323   : > { %1272 = vmatmul.mubr.f32.gmra.mxu0 %v2484_v17  ;;  %v3188_v17 = vld [vmem:[#allocation10_spill] sm:$0xff] }
 0x324   : > { %1276 = vmatprep.mubr.f32.mxu0 %v2487_v18  ;;  %v3189_v18 = vld [vmem:[#allocation11_spill] sm:$0xff] }
 0x327   : > { %1277 = vmatmul.mubr.f32.gmra.mxu0 %v2492_v19  ;;  %v3190_v19 = vld [vmem:[#allocation12_spill] sm:$0xff] }
 0x328   : > { %1281 = vmatprep.mubr.f32.mxu0 %v2495_v20  ;;  %v3191_v20 = vld [vmem:[#allocation13_spill] sm:$0xff] }
 0x32b   : > { %1282 = vmatmul.mubr.f32.gmra.mxu0 %v2500_v21  ;;  %v3192_v21 = vld [vmem:[#allocation14_spill] sm:$0xff] }
 0x32c   : > { %1286 = vmatprep.mubr.f32.mxu0 %v2503_v22  ;;  %v3193_v22 = vld [vmem:[#allocation15_spill] sm:$0xff] }
 0x32f   : > { %1287 = vmatmul.mubr.f32.gmra.mxu0 %v2508_v23  ;;  %v3194_v23 = vld [vmem:[#allocation16_spill] sm:$0xff] }
 0x330   : > { %1291 = vmatprep.mubr.f32.mxu0 %v2511_v24  ;;  %v3195_v24 = vld [vmem:[#allocation17_spill] sm:$0xff] }
 0x333   : > { %1292 = vmatmul.mubr.f32.gmra.mxu0 %v2516_v25  ;;  %v3196_v25 = vld [vmem:[#allocation18_spill] sm:$0xff] }
 0x334   : > { %1296 = vmatprep.mubr.f32.mxu0 %v2519_v26  ;;  %v3197_v26 = vld [vmem:[#allocation19_spill] sm:$0xff] }
 0x337   : > { %1297 = vmatmul.mubr.f32.gmra.mxu0 %v2524_v27  ;;  %v3198_v27 = vld [vmem:[#allocation20_spill] sm:$0xff] }
 0x338   : > { %1301 = vmatprep.mubr.f32.mxu0 %v2527_v28  ;;  %v3199_v28 = vld [vmem:[#allocation21_spill] sm:$0xff] }
 0x33b   : > { %1302 = vmatmul.mubr.f32.gmra.mxu0 %v2532_v29  ;;  %v3200_v29 = vld [vmem:[#allocation22_spill] sm:$0xff] }
 0x33c   : > { %1306 = vmatprep.mubr.f32.mxu0 %v2535_v30  ;;  %v3201_v30 = vld [vmem:[#allocation23_spill] sm:$0xff] }
 0x33f   : > { %1307 = vmatmul.mubr.f32.gmra.mxu0 %v2540_v31  ;;  %v3202_v31 = vld [vmem:[#allocation24_spill] sm:$0xff] }
 0x340   : > { %1311 = vmatprep.mubr.f32.mxu0 %v2543_v32  ;;  %v3203_v32 = vld [vmem:[#allocation25_spill] sm:$0xff] }
 0x343   : > { %1312 = vmatmul.mubr.f32.gmra.mxu0 %v2548_v33  ;;  %v3204_v33 = vld [vmem:[#allocation26_spill] sm:$0xff] }
 0x344   : > { %1316 = vmatprep.mubr.f32.mxu0 %v2551_v34  ;;  %v3205_v34 = vld [vmem:[#allocation27_spill] sm:$0xff] }
 0x347   : > { %1317 = vmatmul.mubr.f32.gmra.mxu0 %v2556_v37  ;;  %v3206_v37 = vld [vmem:[#allocation28_spill] sm:$0xff] }
 0x348   : > { %1321 = vmatprep.mubr.f32.mxu0 %v2559_v38  ;;  %v3207_v38 = vld [vmem:[#allocation29_spill] sm:$0xff] }
 0x34b   : > { %1322 = vmatmul.mubr.f32.gmra.mxu0 %v2564_v39  ;;  %v2873_v39 = vld [vmem:[%s3119_s2 + $0x3] ss:$0 sm:$0xff] }
 0x34c   : > { %1326 = vmatprep.mubr.f32.mxu0 %v2567_v40 }
 0x34f   : > { %1327 = vmatmul.mubr.f32.gmra.mxu0 %v2572_v35 }
 0x350   : > { %1331 = vmatprep.mubr.f32.mxu0 %v2575_v36 }
 0x353   : > { %1332 = vmatmul.mubr.f32.gmra.mxu0 %v2580_v42 }
 0x354   : > { %1336 = vmatprep.mubr.f32.mxu0 %v2583_v43 }
 0x357   : > { %1337 = vmatmul.mubr.f32.gmra.mxu0 %v2588_v44 }
 0x358   : > { %1341 = vmatprep.mubr.f32.mxu0 %v3180_v9 }
 0x35b   : > { %1342 = vmatmul.mubr.f32.gmra.mxu0 %v3181_v10 }
 0x35c   : > { %1346 = vmatprep.mubr.f32.mxu0 %v3182_v11 }
 0x35f   : > { %1347 = vmatmul.mubr.f32.gmra.mxu0 %v3183_v12 }
 0x360   : > { %1351 = vmatprep.mubr.f32.mxu0 %v3184_v13 }
 0x363   : > { %1352 = vmatmul.mubr.f32.gmra.mxu0 %v3185_v14 }
 0x364   : > { %1356 = vmatprep.mubr.f32.mxu0 %v3186_v15 }
 0x367   : > { %1357 = vmatmul.mubr.f32.gmra.mxu0 %v3187_v16 }
 0x368   : > { %1361 = vmatprep.mubr.f32.mxu0 %v3188_v17 }
 0x36b   : > { %1362 = vmatmul.mubr.f32.gmra.mxu0 %v3189_v18 }
 0x36c   : > { %1366 = vmatprep.mubr.f32.mxu0 %v3190_v19 }
 0x36f   : > { %1367 = vmatmul.mubr.f32.gmra.mxu0 %v3191_v20 }
 0x370   : > { %1371 = vmatprep.mubr.f32.mxu0 %v3192_v21 }
 0x373   : > { %1372 = vmatmul.mubr.f32.gmra.mxu0 %v3193_v22 }
 0x374   : > { %1376 = vmatprep.mubr.f32.mxu0 %v3194_v23 }
 0x377   : > { %1377 = vmatmul.mubr.f32.gmra.mxu0 %v3195_v24 }
 0x378   : > { %1381 = vmatprep.mubr.f32.mxu0 %v3196_v25 }
 0x37b   : > { %1382 = vmatmul.mubr.f32.gmra.mxu0 %v3197_v26 }
 0x37c   : > { %1386 = vmatprep.mubr.f32.mxu0 %v3198_v27 }
 0x37f   : > { %1387 = vmatmul.mubr.f32.gmra.mxu0 %v3199_v28 }
 0x380   : > { %1391 = vmatprep.mubr.f32.mxu0 %v3200_v29 }
 0x383   : > { %1392 = vmatmul.mubr.f32.gmra.mxu0 %v3201_v30 }
 0x384   : > { %1396 = vmatprep.mubr.f32.mxu0 %v3202_v31 }
 0x387   : > { %1397 = vmatmul.mubr.f32.gmra.mxu0 %v3203_v32 }
 0x388   : > { %1401 = vmatprep.mubr.f32.mxu0 %v3204_v33 }
 0x38b   : > { %1402 = vmatmul.mubr.f32.gmra.mxu0 %v3205_v34 }
 0x38c   : > { %1406 = vmatprep.mubr.f32.mxu0 %v3206_v37 }
 0x38f   : > { %1407 = vmatmul.mubr.f32.gmra.mxu0 %v3207_v38 }
 0x3d3   : > { %v1253_v40 = vpop.f32.mrf.mxu0 }
 0x3d4   : > { %v1421_v35 = vmul.f32 %v2873_v39, %v1253_v40 }
 0x3d5   : > { %v1255_v36 = vpop.f32.mrf.mxu0 }
 0x3d6   : > { %v1453_v42 = vsel %vm568_vm0, %v1421_v35, 0.0 }
 0x3d7   : > { %1454 = vadd.xlane.f32.xlu0 %v1453_v42  ;;  %v1258_v43 = vpop.f32.mrf.mxu0 }
 0x3d8   : > { %v1422_v44 = vmul.f32 %v2873_v39, %v1258_v43 }
 0x3d9   : > { %v1260_v48 = vpop.f32.mrf.mxu0 }
 0x3da   : > { %v1456_v61 = vsel %vm568_vm0, %v1422_v44, 0.0 }
 0x3db   : > { %1457 = vadd.xlane.f32.xlu0 %v1456_v61  ;;  %v1263_v6 = vpop.f32.mrf.mxu0 }
 0x3dc   : > { %v1423_v5 = vmul.f32 %v2873_v39, %v1263_v6 }
 0x3dd   : > { %v1265_v54 = vpop.f32.mrf.mxu0 }
 0x3de   : > { %v1459_v53 = vsel %vm568_vm0, %v1423_v5, 0.0 }
 0x3df   : > { %1460 = vadd.xlane.f32.xlu0 %v1459_v53  ;;  %v1268_v62 = vpop.f32.mrf.mxu0 }
 0x3e0   : > { %v1424_v45 = vmul.f32 %v2873_v39, %v1268_v62 }
 0x3e1   : > { %v1270_v57 = vpop.f32.mrf.mxu0 }
 0x3e2   : > { %v1462_v55 = vsel %vm568_vm0, %v1424_v45, 0.0 }
 0x3e3   : > { %1463 = vadd.xlane.f32.xlu0 %v1462_v55  ;;  %v1273_v8 = vpop.f32.mrf.mxu0 }
 0x3e4   : > { %v1425_v46 = vmul.f32 %v2873_v39, %v1273_v8 }
 0x3e5   : > { %v1275_v58 = vpop.f32.mrf.mxu0 }
 0x3e6   : > { %v1465_v1 = vsel %vm568_vm0, %v1425_v46, 0.0 }
 0x3e7   : > { %1466 = vadd.xlane.f32.xlu0 %v1465_v1  ;;  %v1278_v49 = vpop.f32.mrf.mxu0 }
 0x3e8   : > { %v1426_v3 = vmul.f32 %v2873_v39, %v1278_v49 }
 0x3e9   : > { %v1280_v56 = vpop.f32.mrf.mxu0 }
 0x3ea   : > { %v1468_v63 = vsel %vm568_vm0, %v1426_v3, 0.0 }
 0x3eb   : > { %1469 = vadd.xlane.f32.xlu0 %v1468_v63  ;;  %v1283_v0 = vpop.f32.mrf.mxu0 }
 0x3ec   : > { %v1427_v2 = vmul.f32 %v2873_v39, %v1283_v0 }
 0x3ed   : > { %v1285_v7 = vpop.f32.mrf.mxu0 }
 0x3ee   : > { %v1471_v41 = vsel %vm568_vm0, %v1427_v2, 0.0 }
 0x3ef   : > { %1472 = vadd.xlane.f32.xlu0 %v1471_v41  ;;  %v1288_v51 = vpop.f32.mrf.mxu0 }
 0x3f0   : > { %v1428_v59 = vmul.f32 %v2873_v39, %v1288_v51 }
 0x3f1   : > { %v1290_v50 = vpop.f32.mrf.mxu0 }
 0x3f2   : > { %v1474_v60 = vsel %vm568_vm0, %v1428_v59, 0.0 }
 0x3f3   : > { %1475 = vadd.xlane.f32.xlu0 %v1474_v60  ;;  %v1293_v52 = vpop.f32.mrf.mxu0 }
 0x3f4   : > { %v1429_v4 = vmul.f32 %v2873_v39, %v1293_v52 }
 0x3f5   : > { %v1295_v9 = vpop.f32.mrf.mxu0 }
 0x3f6   : > { %v1477_v10 = vsel %vm568_vm0, %v1429_v4, 0.0 }
 0x3f7   : > { %1478 = vadd.xlane.f32.xlu1 %v1477_v10  ;;  %v1298_v11 = vpop.f32.mrf.mxu0 }
 0x3f8   : > { %v1430_v12 = vmul.f32 %v2873_v39, %v1298_v11 }
 0x3f9   : > { %v1300_v13 = vpop.f32.mrf.mxu0 }
 0x3fa   : > { %v1480_v14 = vsel %vm568_vm0, %v1430_v12, 0.0 }
 0x3fb   : > { %1481 = vadd.xlane.f32.xlu0 %v1480_v14  ;;  %v1303_v15 = vpop.f32.mrf.mxu0 }
 0x3fc   : > { %v1431_v16 = vmul.f32 %v2873_v39, %v1303_v15 }
 0x3fd   : > { %v1305_v17 = vpop.f32.mrf.mxu0 }
 0x3fe   : > { %v1483_v18 = vsel %vm568_vm0, %v1431_v16, 0.0 }
 0x3ff   : > { %1484 = vadd.xlane.f32.xlu1 %v1483_v18  ;;  %v1308_v19 = vpop.f32.mrf.mxu0 }
 0x400   : > { %v1432_v20 = vmul.f32 %v2873_v39, %v1308_v19 }
 0x401   : > { %v1310_v21 = vpop.f32.mrf.mxu0 }
 0x402   : > { %v1486_v22 = vsel %vm568_vm0, %v1432_v20, 0.0 }
 0x403   : > { %1487 = vadd.xlane.f32.xlu1 %v1486_v22  ;;  %v1313_v23 = vpop.f32.mrf.mxu0 }
 0x404   : > { %v1433_v24 = vmul.f32 %v2873_v39, %v1313_v23 }
 0x405   : > { %v1315_v25 = vpop.f32.mrf.mxu0 }
 0x406   : > { %v1489_v26 = vsel %vm568_vm0, %v1433_v24, 0.0 }
 0x407   : > { %1490 = vadd.xlane.f32.xlu1 %v1489_v26  ;;  %v1318_v27 = vpop.f32.mrf.mxu0 }
 0x408   : > { %v1434_v28 = vmul.f32 %v2873_v39, %v1318_v27 }
 0x409   : > { %v1320_v29 = vpop.f32.mrf.mxu0 }
 0x40a   : > { %v1492_v30 = vsel %vm568_vm0, %v1434_v28, 0.0 }
 0x40b   : > { %1493 = vadd.xlane.f32.xlu1 %v1492_v30  ;;  %v1323_v31 = vpop.f32.mrf.mxu0 }
 0x40c   : > { %v1435_v32 = vmul.f32 %v2873_v39, %v1323_v31 }
 0x40d   : > { %v1325_v33 = vpop.f32.mrf.mxu0 }
 0x40e   : > { %v1495_v34 = vsel %vm568_vm0, %v1435_v32, 0.0 }
 0x40f   : > { %1496 = vadd.xlane.f32.xlu1 %v1495_v34  ;;  %v1328_v37 = vpop.f32.mrf.mxu0 }
 0x410   : > { %v1436_v38 = vmul.f32 %v2873_v39, %v1328_v37 }
 0x411   : > { %v1330_v40 = vpop.f32.mrf.mxu0 }
 0x412   : > { %v1498_v35 = vsel %vm568_vm0, %v1436_v38, 0.0 }
 0x413   : > { %1499 = vadd.xlane.f32.xlu1 %v1498_v35  ;;  %v1333_v36 = vpop.f32.mrf.mxu0 }
 0x414   : > { %v1437_v42 = vmul.f32 %v2873_v39, %v1333_v36 }
 0x415   : > { %v1335_v43 = vpop.f32.mrf.mxu0 }
 0x416   : > { %v1501_v44 = vsel %vm568_vm0, %v1437_v42, 0.0  ;;  %v2942_v43 = vld [vmem:[%s3119_s2 + $0x6] ss:$0 sm:$0xff] }
 0x417   : > { %1502 = vadd.xlane.f32.xlu1 %v1501_v44  ;;  %v1338_v48 = vpop.f32.mrf.mxu0 }
 0x418   : > { %v1438_v61 = vmul.f32 %v2873_v39, %v1338_v48 }
 0x419   : > { %v1340_v6 = vpop.f32.mrf.mxu0 }
 0x41a   : > { %v1504_v5 = vsel %vm568_vm0, %v1438_v61, 0.0 }
 0x41b   : > { %1505 = vadd.xlane.f32.xlu0 %v1504_v5  ;;  %v1343_v54 = vpop.f32.mrf.mxu0 }
 0x41c   : > { %v1439_v53 = vmul.f32 %v2873_v39, %v1343_v54 }
 0x41d   : > { %v1345_v62 = vpop.f32.mrf.mxu0 }
 0x41e   : > { %v1507_v45 = vsel %vm568_vm0, %v1439_v53, 0.0 }
 0x41f   : > { %1508 = vadd.xlane.f32.xlu0 %v1507_v45  ;;  %v1348_v57 = vpop.f32.mrf.mxu0 }
 0x420   : > { %v1440_v55 = vmul.f32 %v2873_v39, %v1348_v57 }
 0x421   : > { %v1350_v8 = vpop.f32.mrf.mxu0 }
 0x422   : > { %v1510_v46 = vsel %vm568_vm0, %v1440_v55, 0.0 }
 0x423   : > { %1511 = vadd.xlane.f32.xlu0 %v1510_v46  ;;  %v1353_v58 = vpop.f32.mrf.mxu0 }
 0x424   : > { %v1441_v1 = vmul.f32 %v2873_v39, %v1353_v58 }
 0x425   : > { %v1355_v49 = vpop.f32.mrf.mxu0 }
 0x426   : > { %v1513_v3 = vsel %vm568_vm0, %v1441_v1, 0.0 }
 0x427   : > { %1514 = vadd.xlane.f32.xlu0 %v1513_v3  ;;  %v1358_v56 = vpop.f32.mrf.mxu0 }
 0x428   : > { %v1442_v63 = vmul.f32 %v2873_v39, %v1358_v56 }
 0x429   : > { %v1360_v0 = vpop.f32.mrf.mxu0 }
 0x42a   : > { %v1516_v2 = vsel %vm568_vm0, %v1442_v63, 0.0 }
 0x42b   : > { %1517 = vadd.xlane.f32.xlu0 %v1516_v2  ;;  %v1363_v7 = vpop.f32.mrf.mxu0 }
 0x42c   : > { %v1443_v41 = vmul.f32 %v2873_v39, %v1363_v7 }
 0x42d   : > { %v1365_v51 = vpop.f32.mrf.mxu0 }
 0x42e   : > { %v1519_v59 = vsel %vm568_vm0, %v1443_v41, 0.0 }
 0x42f   : > { %1520 = vadd.xlane.f32.xlu0 %v1519_v59  ;;  %v1368_v50 = vpop.f32.mrf.mxu0 }
 0x430   : > { %v1444_v60 = vmul.f32 %v2873_v39, %v1368_v50 }
 0x431   : > { %v1370_v52 = vpop.f32.mrf.mxu0 }
 0x432   : > { %v1522_v4 = vsel %vm568_vm0, %v1444_v60, 0.0 }
 0x433   : > { %1523 = vadd.xlane.f32.xlu0 %v1522_v4  ;;  %v1373_v9 = vpop.f32.mrf.mxu0 }
 0x434   : > { %v1445_v10 = vmul.f32 %v2873_v39, %v1373_v9 }
 0x435   : > { %v1375_v11 = vpop.f32.mrf.mxu0 }
 0x436   : > { %v1525_v12 = vsel %vm568_vm0, %v1445_v10, 0.0 }
 0x437   : > { %1526 = vadd.xlane.f32.xlu1 %v1525_v12  ;;  %v1378_v13 = vpop.f32.mrf.mxu0 }
 0x438   : > { %v1446_v14 = vmul.f32 %v2873_v39, %v1378_v13 }
 0x439   : > { %v1380_v15 = vpop.f32.mrf.mxu0 }
 0x43a   : > { %v1528_v16 = vsel %vm568_vm0, %v1446_v14, 0.0 }
 0x43b   : > { %1529 = vadd.xlane.f32.xlu1 %v1528_v16  ;;  %v1383_v17 = vpop.f32.mrf.mxu0 }
 0x43c   : > { %v1447_v18 = vmul.f32 %v2873_v39, %v1383_v17 }
 0x43d   : > { %v1385_v19 = vpop.f32.mrf.mxu0 }
 0x43e   : > { %v1531_v20 = vsel %vm568_vm0, %v1447_v18, 0.0 }
 0x43f   : > { %1532 = vadd.xlane.f32.xlu1 %v1531_v20  ;;  %v1388_v21 = vpop.f32.mrf.mxu0 }
 0x440   : > { %v1448_v22 = vmul.f32 %v2873_v39, %v1388_v21 }
 0x441   : > { %v1390_v23 = vpop.f32.mrf.mxu0 }
 0x442   : > { %v1534_v24 = vsel %vm568_vm0, %v1448_v22, 0.0 }
 0x443   : > { %1535 = vadd.xlane.f32.xlu1 %v1534_v24  ;;  %v1393_v25 = vpop.f32.mrf.mxu0 }
 0x444   : > { %v1449_v26 = vmul.f32 %v2873_v39, %v1393_v25 }
 0x445   : > { %v1395_v27 = vpop.f32.mrf.mxu0 }
 0x446   : > { %v1537_v28 = vsel %vm568_vm0, %v1449_v26, 0.0  ;;  %v303_v26 = vld [vmem:[%s3119_s2 + $0x50] sm:$0xff] }
 0x447   : > { %1538 = vadd.xlane.f32.xlu1 %v1537_v28  ;;  %v1398_v29 = vpop.f32.mrf.mxu0  ;;  %2173 = vmatpush3.msra.mxu1 %v303_v26 }
 0x448   : > { %v1450_v30 = vmul.f32 %v2873_v39, %v1398_v29  ;;  %2174 = vmatprep.subr.mxu1 %v3179_v47 }
 0x449   : > { %v1400_v31 = vpop.f32.mrf.mxu0 }
 0x44a   : > { %v1540_v32 = vsel %vm568_vm0, %v1450_v30, 0.0 }
 0x44b   : > { %1541 = vadd.xlane.f32.xlu1 %v1540_v32  ;;  %v1403_v33 = vpop.f32.mrf.mxu0 }
 0x44c   : > { %v1451_v34 = vmul.f32 %v2873_v39, %v1403_v33 }
 0x44d   : > { %v1405_v37 = vpop.f32.mrf.mxu0 }
 0x44e   : > { %v1543_v38 = vsel %vm568_vm0, %v1451_v34, 0.0  ;;  %v302_v37 = vld [vmem:[%s3119_s2 + $0x48] sm:$0xff] }
 0x44f   : > { %1544 = vadd.xlane.f32.xlu1 %v1543_v38  ;;  %v1408_v40 = vpop.f32.mrf.mxu0  ;;  %2175 = vmatpush3.msra.mxu1 %v302_v37 }
 0x450   : > { %v1452_v35 = vmul.f32 %v2873_v39, %v1408_v40  ;;  %2176 = vmatprep.subr.mxu1 %v3179_v47 }
 0x451   : > { %v1410_v36 = vpop.f32.mrf.mxu0 }
 0x452   : > { %v1546_v42 = vsel %vm568_vm0, %v1452_v35, 0.0 }
 0x453   : > { %1547 = vadd.xlane.f32.xlu0 %v1546_v42 }
 0x460   : > { %v1455_v44 = vpop.xlane.xlu0 %1454 }
 0x461   : > { %v1553_v48 = vadd.f32 %v2942_v43, %v1455_v44 }
 0x463   : > { %1590 = vperm.xlu1 %2205, %v1553_v48  }
 0x464   : > { %v1458_v61 = vpop.xlane.xlu0 %1457 }
 0x465   : > { %v1554_v6 = vadd.f32 %v2942_v43, %v1458_v61 }
 0x467   : > { %1595 = vperm.xlu1 %2205, %v1554_v6   ;;  %v301_v6 = vld [vmem:[%s3119_s2 + $0x40] sm:$0xff] }
 0x468   : > { %v1461_v5 = vpop.xlane.xlu0 %1460  ;;  %2177 = vmatpush3.msra.mxu1 %v301_v6 }
 0x469   : > { %v1555_v39 = vadd.f32 %v2942_v43, %v1461_v5  ;;  %2178 = vmatprep.subr.mxu1 %v3179_v47 }
 0x46b   : > { %1600 = vperm.xlu1 %2205, %v1555_v39   ;;  %v300_v39 = vld [vmem:[%s3119_s2 + $0x38] sm:$0xff] }
 0x46c   : > { %v1464_v54 = vpop.xlane.xlu0 %1463  ;;  %2179 = vmatpush3.msra.mxu1 %v300_v39 }
 0x46d   : > { %v1556_v53 = vadd.f32 %v2942_v43, %v1464_v54  ;;  %v299_v54 = vld [vmem:[%s3119_s2 + $0x30] sm:$0xff]  ;;  %2180 = vmatprep.subr.mxu1 %v3179_v47 }
 0x46e   : > { %2181 = vmatpush3.msra.mxu1 %v299_v54 }
 0x46f   : > { %1605 = vperm.xlu1 %2205, %v1556_v53   ;;  %v254_v53 = vld [vmem:[%s2410_s29 + $0x208] sm:$0xff]  ;;  %2182 = vmatprep.subr.mxu1 %v3179_v47 }
 0x470   : > { %v1467_v62 = vpop.xlane.xlu0 %1466  ;;  %1114 = vmatprep.mubr.f32.mxu1 %v254_v53  ;;  %1411 = vmatprep.mubr.f32.mxu0 %v254_v53 }
 0x471   : > { %v1557_v45 = vadd.f32 %v2942_v43, %v1467_v62  ;;  %v298_v62 = vld [vmem:[%s3119_s2 + $0x28] sm:$0xff] }
 0x472   : > { %2183 = vmatpush3.msra.mxu1 %v298_v62 }
 0x473   : > { %1610 = vperm.xlu1 %2205, %v1557_v45   ;;  %v253_v45 = vld [vmem:[%s2410_s29 + $0x200] sm:$0xff]  ;;  %2184 = vmatprep.subr.mxu1 %v3179_v47 }
 0x474   : > { %v1470_v57 = vpop.xlane.xlu0 %1469  ;;  %1115 = vmatmul.mubr.f32.gmra.mxu1 %v253_v45  ;;  %1412 = vmatmul.mubr.f32.gmra.mxu0 %v253_v45 }
 0x475   : > { %v1558_v55 = vadd.f32 %v2942_v43, %v1470_v57  ;;  %v297_v57 = vld [vmem:[%s3119_s2 + $0x20] sm:$0xff]  ;;  %2188 = vmatprep.mubr.msk.f32.mxu1 %vm2222_vm1, %v3179_v47 }
 0x476   : > { %2185 = vmatpush3.msra.mxu1 %v297_v57 }
 0x477   : > { %1615 = vperm.xlu1 %2205, %v1558_v55   ;;  %v296_v55 = vld [vmem:[%s3119_s2 + $0x18] sm:$0xff]  ;;  %2186 = vmatprep.subr.mxu1 %v3179_v47  ;;  %v1585_v47 = vlaneseq }
 0x478   : > { %v1473_v8 = vpop.xlane.xlu0 %1472  ;;  %2187 = vmatpush3.msra.mxu1 %v296_v55 }
 0x479   : > { %v1559_v46 = vadd.f32 %v2942_v43, %v1473_v8 }
 0x47b   : > { %1620 = vperm.xlu1 %2205, %v1559_v46  }
 0x47c   : > { %v1476_v58 = vpop.xlane.xlu0 %1475 }
 0x47d   : > { %v1560_v1 = vadd.f32 %v2942_v43, %v1476_v58 }
 0x47f   : > { %1625 = vperm.xlu1 %2205, %v1560_v1  }
 0x480   : > { %v1479_v49 = vpop.xlane.xlu1 %1478 }
 0x481   : > { %v1561_v3 = vadd.f32 %v2942_v43, %v1479_v49 }
 0x483   : > { %1647 = vperm.xlu0 %2204, %v1561_v3  }
 0x484   : > { %v1482_v56 = vpop.xlane.xlu0 %1481 }
 0x485   : > { %v1562_v63 = vadd.f32 %v2942_v43, %v1482_v56 }
 0x487   : > { %1652 = vperm.xlu1 %2205, %v1562_v63  }
 0x488   : > { %v1485_v0 = vpop.xlane.xlu1 %1484 }
 0x489   : > { %v1563_v2 = vadd.f32 %v2942_v43, %v1485_v0 }
 0x48b   : > { %1657 = vperm.xlu0 %2204, %v1563_v2  }
 0x48c   : > { %v1488_v7 = vpop.xlane.xlu1 %1487 }
 0x48d   : > { %v1564_v41 = vadd.f32 %v2942_v43, %v1488_v7 }
 0x48f   : > { %1662 = vperm.xlu0 %2204, %v1564_v41  }
 0x490   : > { %v1491_v51 = vpop.xlane.xlu1 %1490 }
 0x491   : > { %v1565_v59 = vadd.f32 %v2942_v43, %v1491_v51 }
 0x493   : > { %1667 = vperm.xlu0 %2204, %v1565_v59  }
 0x494   : > { %v1494_v50 = vpop.xlane.xlu1 %1493 }
 0x495   : > { %v1566_v60 = vadd.f32 %v2942_v43, %v1494_v50 }
 0x497   : > { %1672 = vperm.xlu0 %2204, %v1566_v60  }
 0x498   : > { %v1497_v52 = vpop.xlane.xlu1 %1496 }
 0x499   : > { %v1567_v4 = vadd.f32 %v2942_v43, %v1497_v52 }
 0x49b   : > { %1677 = vperm.xlu0 %2204, %v1567_v4   ;;  %v3020_v4 = vand.u32 127, %v1585_v47 }
 0x49c   : > { %v1500_v9 = vpop.xlane.xlu1 %1499 }
 0x49d   : > { %v1568_v10 = vadd.f32 %v2942_v43, %v1500_v9  ;;  %vm1644_vm2 = vcmp.eq.s32.totalorder %v3020_v4, 1  ;;  %vm1587_vm3 = vcmp.eq.s32.totalorder %v3020_v4, 0  ;;  %vm1701_vm4 = vcmp.eq.s32.totalorder %v3020_v4, 2 }
 0x49e   : > { %vm1758_vm5 = vcmp.eq.s32.totalorder %v3020_v4, 3  ;;  %vm1926_vm7 = vcmp.lt.s32.totalorder %v3020_v4, 16  ;;  %vm1951_vm10 = vcmp.eq.s32.totalorder %v3020_v4, 16 }
 0x49f   : > { %1682 = vperm.xlu0 %2204, %v1568_v10  }
 0x4a0   : > { %v1503_v11 = vpop.xlane.xlu1 %1502 }
 0x4a1   : > { %v1569_v12 = vadd.f32 %v2942_v43, %v1503_v11 }
 0x4a3   : > { %1704 = vperm.xlu0 %2204, %v1569_v12  }
 0x4a4   : > { %v1506_v13 = vpop.xlane.xlu0 %1505 }
 0x4a5   : > { %v1570_v14 = vadd.f32 %v2942_v43, %v1506_v13 }
 0x4a7   : > { %1709 = vperm.xlu1 %2205, %v1570_v14  }
 0x4a8   : > { %v1509_v15 = vpop.xlane.xlu0 %1508 }
 0x4a9   : > { %v1571_v16 = vadd.f32 %v2942_v43, %v1509_v15 }
 0x4ab   : > { %1714 = vperm.xlu1 %2205, %v1571_v16  }
 0x4ac   : > { %v1512_v17 = vpop.xlane.xlu0 %1511 }
 0x4ad   : > { %v1572_v18 = vadd.f32 %v2942_v43, %v1512_v17 }
 0x4af   : > { %1719 = vperm.xlu1 %2205, %v1572_v18  }
 0x4b0   : > { %v1515_v19 = vpop.xlane.xlu0 %1514 }
 0x4b1   : > { %v1573_v20 = vadd.f32 %v2942_v43, %v1515_v19 }
 0x4b3   : > { %1724 = vperm.xlu1 %2205, %v1573_v20  }
 0x4b4   : > { %v1518_v21 = vpop.xlane.xlu0 %1517 }
 0x4b5   : > { %v1574_v22 = vadd.f32 %v2942_v43, %v1518_v21 }
 0x4b7   : > { %1729 = vperm.xlu1 %2205, %v1574_v22  }
 0x4b8   : > { %v1521_v23 = vpop.xlane.xlu0 %1520 }
 0x4b9   : > { %v1575_v24 = vadd.f32 %v2942_v43, %v1521_v23 }
 0x4bb   : > { %1734 = vperm.xlu1 %2205, %v1575_v24  }
 0x4bc   : > { %v1524_v25 = vpop.xlane.xlu0 %1523 }
 0x4bd   : > { %v1576_v27 = vadd.f32 %v2942_v43, %v1524_v25 }
 0x4bf   : > { %1739 = vperm.xlu1 %2205, %v1576_v27  }
 0x4c0   : > { %v1527_v28 = vpop.xlane.xlu1 %1526 }
 0x4c1   : > { %v1577_v29 = vadd.f32 %v2942_v43, %v1527_v28 }
 0x4c3   : > { %1761 = vperm.xlu0 %2204, %v1577_v29  }
 0x4c4   : > { %v1530_v30 = vpop.xlane.xlu1 %1529 }
 0x4c5   : > { %v1578_v31 = vadd.f32 %v2942_v43, %v1530_v30 }
 0x4c7   : > { %1766 = vperm.xlu0 %2204, %v1578_v31  }
 0x4c8   : > { %v1533_v32 = vpop.xlane.xlu1 %1532 }
 0x4c9   : > { %v1579_v33 = vadd.f32 %v2942_v43, %v1533_v32 }
 0x4cb   : > { %1771 = vperm.xlu0 %2204, %v1579_v33  }
 0x4cc   : > { %v1536_v34 = vpop.xlane.xlu1 %1535 }
 0x4cd   : > { %v1580_v38 = vadd.f32 %v2942_v43, %v1536_v34 }
 0x4cf   : > { %1776 = vperm.xlu0 %2204, %v1580_v38  }
 0x4d0   : > { %v1539_v40 = vpop.xlane.xlu1 %1538 }
 0x4d1   : > { %v1581_v35 = vadd.f32 %v2942_v43, %v1539_v40 }
 0x4d3   : > { %1781 = vperm.xlu0 %2204, %v1581_v35  }
 0x4d4   : > { %v1542_v36 = vpop.xlane.xlu1 %1541 }
 0x4d5   : > { %v1582_v42 = vadd.f32 %v2942_v43, %v1542_v36 }
 0x4d7   : > { %1786 = vperm.xlu0 %2204, %v1582_v42  }
 0x4d8   : > { %v1545_v44 = vpop.xlane.xlu1 %1544 }
 0x4d9   : > { %v1583_v48 = vadd.f32 %v2942_v43, %v1545_v44 }
 0x4db   : > { %1791 = vperm.xlu0 %2204, %v1583_v48  }
 0x4dc   : > { %v1548_v61 = vpop.xlane.xlu0 %1547 }
 0x4dd   : > { %v1584_v5 = vadd.f32 %v2942_v43, %v1548_v61 }
 0x4de   : > { %v1591_v8 = vpop.permute.xlu1 %1590 }
 0x4df   : > { %1796 = vperm.xlu1 %2205, %v1584_v5   ;;  %v1628_v12 = vsel %vm1587_vm3, %v1591_v8, 0.0 }
 0x4e2   : > { %v1596_v46 = vpop.permute.xlu1 %1595 }
 0x4e3   : > { %v1629_v19 = vsel %vm1587_vm3, %v1596_v46, 0.0 }
 0x4e6   : > { %v1601_v58 = vpop.permute.xlu1 %1600 }
 0x4e7   : > { %v1630_v28 = vsel %vm1587_vm3, %v1601_v58, 0.0 }
 0x4ea   : > { %v1606_v1 = vpop.permute.xlu1 %1605 }
 0x4eb   : > { %v1631_v38 = vsel %vm1587_vm3, %v1606_v1, 0.0 }
 0x4ee   : > { %v1611_v56 = vpop.permute.xlu1 %1610 }
 0x4ef   : > { %v1632_v5 = vsel %vm1587_vm3, %v1611_v56, 0.0 }
 0x4f2   : > { %v3010_v0 = vpop.permute.xlu1 %1615 }
 0x4f3   : > { %v1633_v46 = vsel %vm1587_vm3, %v3010_v0, 0.0 }
 0x4f6   : > { %v3012_v7 = vpop.permute.xlu1 %1620 }
 0x4fa   : > { %v3014_v51 = vpop.permute.xlu1 %1625 }
 0x4fe   : > { %v1648_v49 = vpop.permute.xlu0 %1647 }
 0x4ff   : > { %v1685_v11 = vsel %vm1644_vm2, %v1648_v49, 0.0 }
 0x500   : > { %v1693_v14 = vadd.f32 %v1685_v11, %v1628_v12 }
 0x502   : > { %v1653_v59 = vpop.permute.xlu1 %1652 }
 0x503   : > { %v1686_v16 = vsel %vm1644_vm2, %v1653_v59, 0.0 }
 0x504   : > { %v1694_v22 = vadd.f32 %v1686_v16, %v1629_v19 }
 0x506   : > { %v1658_v3 = vpop.permute.xlu0 %1657 }
 0x507   : > { %v1687_v24 = vsel %vm1644_vm2, %v1658_v3, 0.0 }
 0x508   : > { %v1695_v31 = vadd.f32 %v1687_v24, %v1630_v28 }
 0x50a   : > { %v1663_v63 = vpop.permute.xlu0 %1662 }
 0x50b   : > { %v1688_v33 = vsel %vm1644_vm2, %v1663_v63, 0.0 }
 0x50c   : > { %v1696_v36 = vadd.f32 %v1688_v33, %v1631_v38  ;;  %v2223_v33 = vmov 1  }
 0x50d   : > { %2206 = vset.pattern.permute.xlu1 %v2223_v33 }
 0x50e   : > { %v1668_v2 = vpop.permute.xlu0 %1667 }
 0x50f   : > { %v1689_v48 = vsel %vm1644_vm2, %v1668_v2, 0.0 }
 0x510   : > { %v1697_v53 = vadd.f32 %v1689_v48, %v1632_v5 }
 0x512   : > { %v1673_v41 = vpop.permute.xlu0 %1672 }
 0x513   : > { %v1690_v45 = vsel %vm1644_vm2, %v1673_v41, 0.0  ;;  %v1634_v41 = vsel %vm1587_vm3, %v3012_v7, 0.0  ;;  %v1635_v7 = vsel %vm1587_vm3, %v3014_v51, 0.0 }
 0x514   : > { %v1698_v49 = vadd.f32 %v1690_v45, %v1633_v46 }
 0x516   : > { %v3016_v50 = vpop.permute.xlu0 %1677 }
 0x517   : > { %v1691_v56 = vsel %vm1644_vm2, %v3016_v50, 0.0 }
 0x518   : > { %v1699_v47 = vadd.f32 %v1691_v56, %v1634_v41 }
 0x51a   : > { %v3018_v52 = vpop.permute.xlu0 %1682 }
 0x51b   : > { %v1692_v50 = vsel %vm1644_vm2, %v3018_v52, 0.0 }
 0x51e   : > { %v1705_v10 = vpop.permute.xlu0 %1704 }
 0x51f   : > { %v1742_v13 = vsel %vm1701_vm4, %v1705_v10, 0.0 }
 0x520   : > { %v1750_v17 = vadd.f32 %v1742_v13, %v1693_v14  ;;  %v1700_v14 = vadd.f32 %v1692_v50, %v1635_v7 }
 0x522   : > { %v1710_v60 = vpop.permute.xlu1 %1709 }
 0x523   : > { %v1743_v20 = vsel %vm1701_vm4, %v1710_v60, 0.0 }
 0x524   : > { %v1751_v25 = vadd.f32 %v1743_v20, %v1694_v22 }
 0x526   : > { %v1715_v9 = vpop.permute.xlu1 %1714 }
 0x527   : > { %v1744_v29 = vsel %vm1701_vm4, %v1715_v9, 0.0 }
 0x528   : > { %v1752_v34 = vadd.f32 %v1744_v29, %v1695_v31 }
 0x52a   : > { %v1720_v15 = vpop.permute.xlu1 %1719 }
 0x52b   : > { %v1745_v40 = vsel %vm1701_vm4, %v1720_v15, 0.0 }
 0x52c   : > { %v1753_v61 = vadd.f32 %v1745_v40, %v1696_v36 }
 0x52e   : > { %v1725_v26 = vpop.permute.xlu1 %1724 }
 0x52f   : > { %v1746_v39 = vsel %vm1701_vm4, %v1725_v26, 0.0  ;;  %v2073_v26 = vld [vmem:[%s3119_s2 + $0x5] ss:$0 sm:$0xff] }
 0x530   : > { %v1754_v57 = vadd.f32 %v1746_v39, %v1697_v53 }
 0x532   : > { %v1730_v42 = vpop.permute.xlu1 %1729 }
 0x533   : > { %v1747_v58 = vsel %vm1701_vm4, %v1730_v42, 0.0 }
 0x534   : > { %v1755_v63 = vadd.f32 %v1747_v58, %v1698_v49  ;;  %v1116_v19 = vpop.f32.mrf.mxu1 }
 0x536   : > { %v1735_v55 = vpop.permute.xlu1 %1734  ;;  %v1117_v20 = vpop.f32.mrf.mxu1 }
 0x537   : > { %v1748_v0 = vsel %vm1701_vm4, %v1735_v55, 0.0 }
 0x538   : > { %v1756_v10 = vadd.f32 %v1748_v0, %v1699_v47 }
 0x53a   : > { %v1740_v60 = vpop.permute.xlu1 %1739 }
 0x53b   : > { %v1749_v12 = vsel %vm1701_vm4, %v1740_v60, 0.0 }
 0x53c   : > { %v1757_v16 = vadd.f32 %v1749_v12, %v1700_v14 }
 0x53e   : > { %v1762_v18 = vpop.permute.xlu0 %1761 }
 0x53f   : > { %v1799_v21 = vsel %vm1758_vm5, %v1762_v18, 0.0 }
 0x540   : > { %v1807_v23 = vadd.f32 %v1799_v21, %v1750_v17  ;;  %v1413_v21 = vpop.f32.mrf.mxu0 }
 0x541   : > { %v1945_v29 = vmul.f32 %v2073_v26, %v1413_v21 }
 0x542   : > { %1819 = vxpose.xlu0.b32.start [1/8] (short) (narrow) %v1807_v23, 8  ;;  %v1767_v27 = vpop.permute.xlu0 %1766  ;;  %v1415_v22 = vpop.f32.mrf.mxu0  ;;  %v2071_v23 = vld [vmem:[%s3119_s2 + $0x4] ss:$0 sm:$0xff] }
 0x543   : > { %v1800_v30 = vsel %vm1758_vm5, %v1767_v27, 0.0 }
 0x544   : > { %v1808_v32 = vadd.f32 %v1800_v30, %v1751_v25 }
 0x546   : > { %1820 = vxpose.xlu0.b32.cont [2/8] (short) (narrow) %v1808_v32, 8  ;;  %v1772_v37 = vpop.permute.xlu0 %1771  ;;  %v1947_v32 = vsel %vm1946_vm9, %v1945_v29, 0.0 }
 0x547   : > { %v1801_v35 = vsel %vm1758_vm5, %v1772_v37, 0.0 }
 0x548   : > { %v1809_v44 = vadd.f32 %v1801_v35, %v1752_v34 }
 0x54a   : > { %1821 = vxpose.xlu0.b32.cont [3/8] (short) (narrow) %v1809_v44, 8  ;;  %v1777_v6 = vpop.permute.xlu0 %1776 }
 0x54b   : > { %v1802_v54 = vsel %vm1758_vm5, %v1777_v6, 0.0 }
 0x54c   : > { %v1810_v62 = vadd.f32 %v1802_v54, %v1753_v61 }
 0x54e   : > { %1822 = vxpose.xlu0.b32.cont [4/8] (short) (narrow) %v1810_v62, 8  ;;  %v1782_v8 = vpop.permute.xlu0 %1781 }
 0x54f   : > { %v1803_v1 = vsel %vm1758_vm5, %v1782_v8, 0.0 }
 0x550   : > { %v1811_v3 = vadd.f32 %v1803_v1, %v1754_v57 }
 0x552   : > { %1823 = vxpose.xlu0.b32.cont [5/8] (short) (narrow) %v1811_v3, 8  ;;  %v1787_v2 = vpop.permute.xlu0 %1786 }
 0x553   : > { %v1804_v59 = vsel %vm1758_vm5, %v1787_v2, 0.0 }
 0x554   : > { %v1812_v9 = vadd.f32 %v1804_v59, %v1755_v63 }
 0x556   : > { %1824 = vxpose.xlu0.b32.cont [6/8] (short) (narrow) %v1812_v9, 8  ;;  %v1792_v11 = vpop.permute.xlu0 %1791 }
 0x557   : > { %v1805_v13 = vsel %vm1758_vm5, %v1792_v11, 0.0 }
 0x558   : > { %v1813_v15 = vadd.f32 %v1805_v13, %v1756_v10 }
 0x55a   : > { %v1797_v17 = vpop.permute.xlu1 %1796  ;;  %1825 = vxpose.xlu0.b32.cont [7/8] (short) (narrow) %v1813_v15, 8 }
 0x55b   : > { %v1806_v52 = vsel %vm1758_vm5, %v1797_v17, 0.0 }
 0x55c   : > { %v1814_v18 = vadd.f32 %v1806_v52, %v1757_v16 }
 0x55e   : > { %1826 = vxpose.xlu0.b32.end [8/8] (short) (narrow) %v1814_v18, 8 }
 0x587   : > { %2207 = vset.pattern.permute.xlu0 %v2223_v33 }
 0x5be   : > { %v1835_v51 = vpop.trf.xlu0 }
 0x5bf   : > { %2189 = vmatmul.mubr.msk.f32.vlgmr.msra.gmra.mxu1 %vm1851_vm6, %v1835_v51 }
 0x67f   : > { %v1921_v24 = vpop.f32.mrf.mxu1 }
 0x680   : > { %v1922_v25 = vadd.f32 %v2071_v23, %v1921_v24 }
 0x681   : > { %v2190_v27 = vpop.f32.mrf.mxu1 }
 0x682   : > { %v1925_v28 = vmax.f32 %v1922_v25, 0.0 }
 0x684   : > { %v1927_v30 = vsel %vm1926_vm7, %v1925_v28, -1e+30 }
 0x685   : > { %v1929_v31 = vsel %vm1928_vm8, %v1927_v30, -inf }
 0x686   : > { %1930 = vmax.xlane.f32.xlu1 %v1929_v31 }
 0x68a   : > { %1948 = vadd.xlane.f32.xlu1 %v1947_v32 }
 0x70f   : > { %v1931_v34 = vpop.xlane.xlu1 %1930 }
 0x710   : > { %v1932_v37 = vsub.f32 %v1927_v30, %v1931_v34 }
 0x712   : > { %v1933_v38 = vmul.f32 1.442695, %v1932_v37 }
 0x713   : > { %v1949_v42 = vpop.xlane.xlu1 %1948 }
 0x714   : > { %2208 = vpow2.f32 %v1933_v38  ;;  %v1950_v44 = vadd.f32 %v2942_v43, %v1949_v42 }
 0x721   : > { %v2209_v40 = vpop.eup %2208 }
 0x722   : > { %v1935_v35 = vsel %vm1926_vm7, %v2209_v40, 0.0 }
 0x723   : > { %v1936_v36 = vsel %vm1928_vm8, %v1935_v35, 0.0 }
 0x724   : > { %1937 = vadd.xlane.f32.xlu1 %v1936_v36 }
 0x735   : > { %1954 = vperm.xlu1 %2206, %v1950_v44  }
 0x7ad   : > { %v1938_v48 = vpop.xlane.xlu1 %1937 }
 0x7ae   : > { %2210 = vrcp.f32 %v1938_v48 }
 0x7b1   : > { %v1955_v61 = vpop.permute.xlu1 %1954 }
 0x7b2   : > { %v1957_v5 = vsel %vm1951_vm10, %v1955_v61, 0.0 }
 0x7bb   : > { %v2211_v6 = vpop.eup %2210 }
 0x7bc   : > { %v1940_v39 = vmul.f32 %v2211_v6, %v1935_v35 }
 0x7be   : > { %v1958_v54 = vadd.f32 %v1957_v5, %v1940_v39 }
 0x7c0   : > { %1959 = vst [vmem:[%s188_s7] sm:$0xf] %v1958_v54 }
 0x7c1 PF: > { %s13_s12 = sadd.s32 1, %s2218_s12  }
 0x7c2   : > { %p10_p4 = scmp.ge.s32.totalorder %s13_s12, 4  }
 0x7c4   :  { %12 = sbr.rel (!%p10_p4) target bundleno = 1 (0x1), region = 65 }

</bundles_post_ra>
